<compile_context>
chip_gen: v7x
topology: tpu7x:2x2x1
jax: 0.10.0
libtpu: 0.0.40
codegen_flags: <defaults>
</compile_context>

<pallas_src>
import jax
import jax.numpy as jnp
from jax import lax
from jax.experimental import pallas as pl
from jax.experimental.pallas import tpu as pltpu


# ----------------------------------------------------------------------------------
# kw-folded per-kernel-row matrices (tiny, constant-folded under jit)
# ----------------------------------------------------------------------------------

def _conv_kw_mats(w, w_in):
    """w: (Cout, Cin, 4, 4) torch Conv2d weight.
    Returns f32 (4, w_in*Cin, (w_in//2)*Cout): mats[kh] maps one un-padded NHWC input row to
    one output row for kernel row kh, folding the k=4/s=2/p=1 structure along W."""
    cout, cin, k, _ = w.shape
    wo = w_in // 2
    c = jnp.arange(w_in)
    j = jnp.arange(wo)
    kw = c[None, :] + 1 - 2 * j[:, None]                                 # (wo, w_in)
    valid = (kw >= 0) & (kw < k)
    kw_c = jnp.clip(kw, 0, k - 1)
    w_hw = jnp.transpose(w, (2, 3, 1, 0)).astype(jnp.float32)            # (kh, kw, Cin, Cout)
    band = jnp.where(valid[None, :, :, None, None], w_hw[:, kw_c], 0.0)  # (4, wo, w_in, Cin, Cout)
    return jnp.transpose(band, (0, 2, 3, 1, 4)).reshape(k, w_in * cin, wo * cout)


def _deconv_kw_mats(w_t, w_in):
    """w_t: (Cin, Cout, 4, 4) torch ConvTranspose2d weight.
    Returns f32 (4, w_in*Cin, 2*w_in*Cout): mats[kh] maps one input row to one output row;
    output row n gets input row ih through mats[kh] with kh = n - 2*ih + 1."""
    cin, cout, k, _ = w_t.shape
    w_out = 2 * w_in
    ow = jnp.arange(w_out)
    c = jnp.arange(w_in)
    kw = ow[:, None] - 2 * c[None, :] + 1                                # (w_out, w_in)
    valid = (kw >= 0) & (kw < k)
    kw_c = jnp.clip(kw, 0, k - 1)
    w_kk = jnp.transpose(w_t, (2, 3, 0, 1)).astype(jnp.float32)          # (kh, kw, Cin, Cout)
    band = jnp.where(valid[None, :, :, None, None], w_kk[:, kw_c], 0.0)  # (4, w_out, w_in, Cin, Cout)
    return jnp.transpose(band, (0, 2, 3, 1, 4)).reshape(k, w_in * cin, w_out * cout)


# ----------------------------------------------------------------------------------
# packed 3-tap weights: rows of every level are packed 2^(L-l) per stored row, so that
#   out_packed[t] = ext[t] @ taps[0] + ext[t+1] @ taps[1] + ext[t+2] @ taps[2] + bias
# where ext[1:T+1] holds the packed input and ext[0]/ext[T+1] are zero border rows.
# ----------------------------------------------------------------------------------

def _pack_down_taps(w, b, w_in, cin, cout, p_in, dtype):
    """Conv2d(k=4,s=2,p=1): input packed p_in rows/stored-row -> output packed p_in//2."""
    p_out = p_in // 2
    wo = w_in // 2
    mats = _conv_kw_mats(w, w_in)
    kb, nb = w_in * cin, wo * cout
    taps = [jnp.zeros((p_in * kb, p_out * nb), jnp.float32) for _ in range(3)]

    def place(ti, q, a, m):
        taps[ti] = taps[ti].at[q * kb:(q + 1) * kb, a * nb:(a + 1) * nb].set(m)

    for a in range(p_out):                       # output sub-row inside the packed row
        for kh in range(4):
            q = 2 * a - 1 + kh                   # orig-row offset inside packed input row t
            if q < 0:
                place(0, p_in - 1, a, mats[kh])  # comes from packed row t-1 (ext[t])
            elif q >= p_in:
                place(2, 0, a, mats[kh])         # comes from packed row t+1 (ext[t+2])
            else:
                place(1, q, a, mats[kh])         # comes from packed row t   (ext[t+1])
    bias = jnp.tile(b.astype(jnp.float32), p_out * wo)[None, :]
    return jnp.stack(taps).astype(dtype), bias


def _pack_up_taps(w_t, b, w_in, cin, cout, p_in, dtype):
    """ConvTranspose2d(k=4,s=2,p=1): input packed p_in -> output packed 2*p_in."""
    p_out = 2 * p_in
    w_out = 2 * w_in
    mats = _deconv_kw_mats(w_t, w_in)
    kb, nb = w_in * cin, w_out * cout
    taps = [jnp.zeros((p_in * kb, p_out * nb), jnp.float32) for _ in range(3)]

    def place(ti, q, bb, m):
        taps[ti] = taps[ti].at[q * kb:(q + 1) * kb, bb * nb:(bb + 1) * nb].set(m)

    for c in range(p_in):
        for bb, q, kh in ((2 * c, c - 1, 3), (2 * c, c, 1),
                          (2 * c + 1, c, 2), (2 * c + 1, c + 1, 0)):
            if q < 0:
                place(0, p_in - 1, bb, mats[kh])
            elif q >= p_in:
                place(2, 0, bb, mats[kh])
            else:
                place(1, q, bb, mats[kh])
    bias = jnp.tile(b.astype(jnp.float32), p_out * w_out)[None, :]
    return jnp.stack(taps).astype(dtype), bias


# ----------------------------------------------------------------------------------
# the single fused Pallas kernel (one batch image per grid step)
# ----------------------------------------------------------------------------------

def _make_fused_kernel(T, widths, L, compute_dtype):
    n_in = 2 + 5 * L

    def kernel(*refs):
        alpha_ref = refs[0]                      # (2L,) f32 in SMEM
        x0_ref = refs[1]                         # (T, widths[0]) packed ft_h
        ftl_refs = refs[2:2 + L]                 # packed ft_l tensors (coarsest first)
        dw = [refs[2 + L + 2 * i] for i in range(L)]
        db = [refs[2 + L + 2 * i + 1] for i in range(L)]
        uw = [refs[2 + 3 * L + 2 * i] for i in range(L)]
        ub = [refs[2 + 3 * L + 2 * i + 1] for i in range(L)]
        out_ref = refs[n_in]                     # (T, widths[0])
        ext = list(refs[n_in + 1:n_in + 2 + L])  # L+1 zero-bordered VMEM scratches

        f32 = jnp.float32

        def taps_dot(src, w_ref):
            a0 = src[0:T, :].astype(compute_dtype)
            a1 = src[1:T + 1, :].astype(compute_dtype)
            a2 = src[2:T + 2, :].astype(compute_dtype)
            acc = jnp.dot(a0, w_ref[0], preferred_element_type=f32)
            acc = acc + jnp.dot(a1, w_ref[1], preferred_element_type=f32)
            acc = acc + jnp.dot(a2, w_ref[2], preferred_element_type=f32)
            return acc

        def prelu(v, a):
            return jnp.where(v >= 0, v, a * v)

        # zero the two border rows of every level scratch, load level-0 input interior
        for l in range(L + 1):
            z = jnp.zeros((1, widths[l]), f32)
            ext[l][0:1, :] = z
            ext[l][T + 1:T + 2, :] = z
        ext[0][1:T + 1, :] = x0_ref[...].astype(f32)

        # down path: Conv2d(k4,s2,p1)+PReLU, output written into the next level's interior
        for i in range(L):
            acc = taps_dot(ext[i], dw[i]) + db[i][...]
            ext[i + 1][1:T + 1, :] = prelu(acc, alpha_ref[i])

        # up path: (ft_fusion - ft_l) -> ConvTranspose2d(k4,s2,p1)+PReLU -> + skip
        for i in range(L):
            lvl = L - i
            ext[lvl][1:T + 1, :] = ext[lvl][1:T + 1, :] - ftl_refs[i][...].astype(f32)
            acc = taps_dot(ext[lvl], uw[i]) + ub[i][...]
            y = prelu(acc, alpha_ref[L + i])
            if lvl == 1:
                # final level-0 output; skip is the original ft_h (lane-dense 128-multiple store)
                out_ref[...] = (y + x0_ref[...].astype(f32)).astype(out_ref.dtype)
            else:
                # skip is the down-path value kept in VMEM; result becomes next ft_fusion
                ext[lvl - 1][1:T + 1, :] = y + ext[lvl - 1][1:T + 1, :]

    return kernel


# ----------------------------------------------------------------------------------
# wrapper: layout prep (transposes + free reshapes), weight packing, single pallas_call
# ----------------------------------------------------------------------------------

def decoder_mdc_iter1_fused(ft_h, ft_l_list, down_params, up_params, num_ft,
                            compute_dtype=jnp.float32):
    L = len(ft_l_list)
    if L == 0:
        return ft_h
    B, C0, H0, W0 = ft_h.shape
    assert H0 % (1 << L) == 0 and W0 % (1 << L) == 0
    T = H0 >> L

    Hs = [H0 >> l for l in range(L + 1)]
    Ws = [W0 >> l for l in range(L + 1)]
    Cs = [C0 << l for l in range(L + 1)]
    packs = [1 << (L - l) for l in range(L + 1)]
    widths = [packs[l] * Ws[l] * Cs[l] for l in range(L + 1)]

    f32 = jnp.float32
    # XLA-side prep: NCHW->NHWC transpose then a FREE row-packing reshape (no pads, no casts)
    x0 = jnp.transpose(ft_h, (0, 2, 3, 1)).reshape(B, T, widths[0]).astype(f32)
    ftl = []
    for i in range(L):
        lvl = L - i
        assert ft_l_list[i].shape == (B, Cs[lvl], Hs[lvl], Ws[lvl])
        ftl.append(jnp.transpose(ft_l_list[i], (0, 2, 3, 1))
                   .reshape(B, T, widths[lvl]).astype(f32))

    dw, db, uw, ub, alphas = [], [], [], [], []
    for i in range(L):
        p = down_params[num_ft - L + i]
        assert p['w'].shape[:2] == (Cs[i + 1], Cs[i])
        w3, br = _pack_down_taps(p['w'], p['b'], Ws[i], Cs[i], Cs[i + 1],
                                 packs[i], compute_dtype)
        dw.append(w3); db.append(br); alphas.append(jnp.asarray(p['alpha'], f32))
    for i in range(L):
        lvl = L - i
        p = up_params[num_ft - i - 1]
        assert p['w'].shape[:2] == (Cs[lvl], Cs[lvl - 1])
        w3, br = _pack_up_taps(p['w'], p['b'], Ws[lvl], Cs[lvl], Cs[lvl - 1],
                               packs[lvl], compute_dtype)
        uw.append(w3); ub.append(br); alphas.append(jnp.asarray(p['alpha'], f32))
    alphas_arr = jnp.stack(alphas)                                    # (2L,) f32

    kernel = _make_fused_kernel(T, widths, L, compute_dtype)

    in_specs = [pl.BlockSpec(memory_space=pltpu.MemorySpace.SMEM),
                pl.BlockSpec((None, T, widths[0]), lambda b: (b, 0, 0))]
    for i in range(L):
        in_specs.append(pl.BlockSpec((None, T, widths[L - i]), lambda b: (b, 0, 0)))
    for i in range(L):
        in_specs.append(pl.BlockSpec(dw[i].shape, lambda b: (0, 0, 0)))
        in_specs.append(pl.BlockSpec(db[i].shape, lambda b: (0, 0)))
    for i in range(L):
        in_specs.append(pl.BlockSpec(uw[i].shape, lambda b: (0, 0, 0)))
        in_specs.append(pl.BlockSpec(ub[i].shape, lambda b: (0, 0)))

    out = pl.pallas_call(
        kernel,
        out_shape=jax.ShapeDtypeStruct((B, T, widths[0]), f32),
        grid_spec=pltpu.PrefetchScalarGridSpec(
            num_scalar_prefetch=0,
            grid=(B,),
            in_specs=in_specs,
            out_specs=pl.BlockSpec((None, T, widths[0]), lambda b: (b, 0, 0)),
            scratch_shapes=[pltpu.VMEM((T + 2, widths[l]), f32) for l in range(L + 1)],
        ),
        compiler_params=pltpu.CompilerParams(dimension_semantics=("parallel",)),
    )(alphas_arr, x0, *ftl,
      *[a for pair in zip(dw, db) for a in pair],
      *[a for pair in zip(uw, ub) for a in pair])

    # free reshape back to NHWC, then NCHW for the public API
    return jnp.transpose(out.reshape(B, H0, W0, C0), (0, 3, 1, 2))


# ----------------------------------------------------------------------------------
# pure-lax reference (for correctness check)
# ----------------------------------------------------------------------------------

def _ref_conv(x, w, b, alpha, stride=2, pad=1):
    w_hwio = jnp.transpose(w, (2, 3, 1, 0))
    y = lax.conv_general_dilated(x, w_hwio, (stride, stride), ((pad, pad), (pad, pad)),
                                 dimension_numbers=('NHWC', 'HWIO', 'NHWC'))
    y = y + b
    return jnp.where(y >= 0, y, alpha * y)


def _ref_deconv(x, w_t, b, alpha, stride=2, pad=1):
    k = w_t.shape[2]
    w_conv = jnp.transpose(w_t[:, :, ::-1, ::-1], (1, 0, 2, 3))
    w_hwio = jnp.transpose(w_conv, (2, 3, 1, 0))
    pp = k - 1 - pad
    y = lax.conv_general_dilated(x, w_hwio, (1, 1), ((pp, pp), (pp, pp)),
                                 lhs_dilation=(stride, stride),
                                 dimension_numbers=('NHWC', 'HWIO', 'NHWC'))
    y = y + b
    return jnp.where(y >= 0, y, alpha * y)


# ----------------------------------------------------------------------------------
# Decoder_MDCBlock1 (public API is NCHW, matching the PyTorch module)
# ----------------------------------------------------------------------------------

class DecoderMDCBlock1:

    def __init__(self, num_filter, num_ft, key, kernel_size=4, stride=2, padding=1,
                 mode='iter1', compute_dtype=jnp.float32):
        assert mode in ('iter1', 'conv')
        assert (kernel_size, stride, padding) == (4, 2, 1), \
            "Pallas path is specialised to the module defaults k=4, s=2, p=1"
        self.mode = mode
        self.num_ft = num_ft - 1
        self.compute_dtype = compute_dtype
        self.down, self.up = [], []
        for i in range(self.num_ft):
            cin = num_filter * 2 ** i
            cout = num_filter * 2 ** (i + 1)
            key, k1, k2, k3, k4 = jax.random.split(key, 5)
            # down: Conv2d(cin -> cout), torch weight layout (cout, cin, k, k)
            self.down.append(dict(
                w=jax.random.normal(k1, (cout, cin, kernel_size, kernel_size), jnp.float32) * 0.05,
                b=jax.random.normal(k2, (cout,), jnp.float32) * 0.05,
                alpha=jnp.float32(0.25)))
            # up: ConvTranspose2d(cout -> cin), torch layout (in_ch=cout, out_ch=cin, k, k)
            self.up.append(dict(
                w=jax.random.normal(k3, (cout, cin, kernel_size, kernel_size), jnp.float32) * 0.05,
                b=jax.random.normal(k4, (cin,), jnp.float32) * 0.05,
                alpha=jnp.float32(0.25)))

    # --------------- fused Pallas forward ---------------
    def __call__(self, ft_h, ft_l_list):
        return decoder_mdc_iter1_fused(ft_h, list(ft_l_list), self.down, self.up,
                                       self.num_ft, self.compute_dtype)

    # --------------- pure-lax reference ---------------
    def ref_forward(self, ft_h, ft_l_list):
        to_nhwc = lambda t: jnp.transpose(t, (0, 2, 3, 1))
        to_nchw = lambda t: jnp.transpose(t, (0, 3, 1, 2))
        x = to_nhwc(ft_h)
        ft_l_list = [to_nhwc(t) for t in ft_l_list]
        L = len(ft_l_list)
        ft_h_list = []
        for i in range(L):
            ft_h_list.append(x)
            p = self.down[self.num_ft - L + i]
            x = _ref_conv(x, p['w'], p['b'], p['alpha'])
        ft_fusion = x
        for i in range(L):
            p = self.up[self.num_ft - i - 1]
            ft_fusion = (_ref_deconv(ft_fusion - ft_l_list[i], p['w'], p['b'], p['alpha'])
                         + ft_h_list[L - i - 1])
        return to_nchw(ft_fusion)


if __name__ == "__main__":
    key = jax.random.PRNGKey(0)
    kp, kx, k1, k2 = jax.random.split(key, 4)

    B, nf, H = 2, 4, 16
    num_ft = 3                                 # -> 2 down convs, 2 up deconvs
    model = DecoderMDCBlock1(nf, num_ft, kp)

    # ft_h: full-res decoder feature; ft_l_list: lower-res features (coarsest first)
    ft_h = jax.random.normal(kx, (B, nf, H, H), jnp.float32)                      # (2, 4, 16, 16)
    ft_l_list = [
        jax.random.normal(k1, (B, nf * 4, H // 4, H // 4), jnp.float32),          # (2, 16, 4, 4)
        jax.random.normal(k2, (B, nf * 2, H // 2, H // 2), jnp.float32),          # (2, 8, 8, 8)
    ]

    fwd = jax.jit(model.__call__)
    out = jax.block_until_ready(fwd(ft_h, ft_l_list))

    ref = model.ref_forward(ft_h, ft_l_list)
    assert out.shape == (B, nf, H, H), out.shape
    max_err = float(jnp.max(jnp.abs(out - ref)))
    assert max_err < 5e-4, f"f32 max_err={max_err}"

    # bf16 MXU-operand variant (same params, f32 accumulation/epilogue): loose tolerance.
    model_bf16 = DecoderMDCBlock1(nf, num_ft, kp, compute_dtype=jnp.bfloat16)
    out_bf16 = jax.block_until_ready(jax.jit(model_bf16.__call__)(ft_h, ft_l_list))
    max_err_bf16 = float(jnp.max(jnp.abs(out_bf16 - ref)))
    assert max_err_bf16 < 1e-1, f"bf16 max_err={max_err_bf16}"

    print("KERNEL_OK")
</pallas_src>

<mosaic_0001>
module attributes {stable_mosaic.version = 11 : i64} {
  func.func @kernel(%arg0: i32, %arg1: memref<4xf32, #tpu.memory_space<smem>>, %arg2: memref<1x4x256xf32, #tpu.memory_space<vmem>>, %arg3: memref<1x4x64xf32, #tpu.memory_space<vmem>>, %arg4: memref<1x4x128xf32, #tpu.memory_space<vmem>>, %arg5: memref<3x256x128xf32, #tpu.memory_space<vmem>>, %arg6: memref<1x128xf32, #tpu.memory_space<vmem>>, %arg7: memref<3x128x64xf32, #tpu.memory_space<vmem>>, %arg8: memref<1x64xf32, #tpu.memory_space<vmem>>, %arg9: memref<3x64x128xf32, #tpu.memory_space<vmem>>, %arg10: memref<1x128xf32, #tpu.memory_space<vmem>>, %arg11: memref<3x128x256xf32, #tpu.memory_space<vmem>>, %arg12: memref<1x256xf32, #tpu.memory_space<vmem>>, %arg13: memref<1x4x256xf32, #tpu.memory_space<vmem>>, %arg14: memref<6x256xf32, #tpu.memory_space<vmem>>, %arg15: memref<6x128xf32, #tpu.memory_space<vmem>>, %arg16: memref<6x64xf32, #tpu.memory_space<vmem>>) attributes {dimension_semantics = [#tpu.dimension_semantics<parallel>], iteration_bounds = array<i64: 2>, scalar_prefetch = 0 : i64, scratch_operands = 3 : i64, tpu.core_type = #tpu.core_type<tc>, window_params = [{transform_indices = @transform_0, window_bounds = array<i64: 4>}, {transform_indices = @transform_1, window_bounds = array<i64: 1, 4, 256>}, {transform_indices = @transform_2, window_bounds = array<i64: 1, 4, 64>}, {transform_indices = @transform_3, window_bounds = array<i64: 1, 4, 128>}, {pipeline_mode = #tpu.pipeline_mode<synchronous>, transform_indices = @transform_4, window_bounds = array<i64: 3, 256, 128>}, {pipeline_mode = #tpu.pipeline_mode<synchronous>, transform_indices = @transform_5, window_bounds = array<i64: 1, 128>}, {pipeline_mode = #tpu.pipeline_mode<synchronous>, transform_indices = @transform_6, window_bounds = array<i64: 3, 128, 64>}, {pipeline_mode = #tpu.pipeline_mode<synchronous>, transform_indices = @transform_7, window_bounds = array<i64: 1, 64>}, {pipeline_mode = #tpu.pipeline_mode<synchronous>, transform_indices = @transform_8, window_bounds = array<i64: 3, 64, 128>}, {pipeline_mode = #tpu.pipeline_mode<synchronous>, transform_indices = @transform_9, window_bounds = array<i64: 1, 128>}, {pipeline_mode = #tpu.pipeline_mode<synchronous>, transform_indices = @transform_10, window_bounds = array<i64: 3, 128, 256>}, {pipeline_mode = #tpu.pipeline_mode<synchronous>, transform_indices = @transform_11, window_bounds = array<i64: 1, 256>}, {transform_indices = @transform_12, window_bounds = array<i64: 1, 4, 256>}]} {
    %cst = arith.constant 0.000000e+00 : f32
    %0 = vector.broadcast %cst : f32 to vector<1x256xf32>
    %c0 = arith.constant 0 : index
    %c0_0 = arith.constant 0 : index
    %1 = vector.load %arg14[%c0, %c0_0] : memref<6x256xf32, #tpu.memory_space<vmem>>, vector<1x256xf32>
    tpu.vector_store %arg14[%c0, %c0_0], %0 {strides = array<i32>} : memref<6x256xf32, #tpu.memory_space<vmem>>, vector<1x256xf32>,
    %c5 = arith.constant 5 : index
    %c0_1 = arith.constant 0 : index
    %2 = vector.load %arg14[%c5, %c0_1] : memref<6x256xf32, #tpu.memory_space<vmem>>, vector<1x256xf32>
    tpu.vector_store %arg14[%c5, %c0_1], %0 {strides = array<i32>} : memref<6x256xf32, #tpu.memory_space<vmem>>, vector<1x256xf32>,
    %cst_2 = arith.constant 0.000000e+00 : f32
    %3 = vector.broadcast %cst_2 : f32 to vector<1x128xf32>
    %c0_3 = arith.constant 0 : index
    %c0_4 = arith.constant 0 : index
    %4 = vector.load %arg15[%c0_3, %c0_4] : memref<6x128xf32, #tpu.memory_space<vmem>>, vector<1x128xf32>
    tpu.vector_store %arg15[%c0_3, %c0_4], %3 {strides = array<i32>} : memref<6x128xf32, #tpu.memory_space<vmem>>, vector<1x128xf32>,
    %c5_5 = arith.constant 5 : index
    %c0_6 = arith.constant 0 : index
    %5 = vector.load %arg15[%c5_5, %c0_6] : memref<6x128xf32, #tpu.memory_space<vmem>>, vector<1x128xf32>
    tpu.vector_store %arg15[%c5_5, %c0_6], %3 {strides = array<i32>} : memref<6x128xf32, #tpu.memory_space<vmem>>, vector<1x128xf32>,
    %cst_7 = arith.constant 0.000000e+00 : f32
    %6 = vector.broadcast %cst_7 : f32 to vector<1x64xf32>
    %c0_8 = arith.constant 0 : index
    %c0_9 = arith.constant 0 : index
    %7 = vector.load %arg16[%c0_8, %c0_9] : memref<6x64xf32, #tpu.memory_space<vmem>>, vector<1x64xf32>
    tpu.vector_store %arg16[%c0_8, %c0_9], %6 {strides = array<i32>} : memref<6x64xf32, #tpu.memory_space<vmem>>, vector<1x64xf32>,
    %c5_10 = arith.constant 5 : index
    %c0_11 = arith.constant 0 : index
    %8 = vector.load %arg16[%c5_10, %c0_11] : memref<6x64xf32, #tpu.memory_space<vmem>>, vector<1x64xf32>
    tpu.vector_store %arg16[%c5_10, %c0_11], %6 {strides = array<i32>} : memref<6x64xf32, #tpu.memory_space<vmem>>, vector<1x64xf32>,
    %c0_12 = arith.constant 0 : index
    %c0_13 = arith.constant 0 : index
    %c0_14 = arith.constant 0 : index
    %9 = vector.load %arg2[%c0_12, %c0_13, %c0_14] : memref<1x4x256xf32, #tpu.memory_space<vmem>>, vector<1x4x256xf32>
    %10 = vector.shape_cast %9 : vector<1x4x256xf32> to vector<4x256xf32>
    %c1 = arith.constant 1 : index
    %c0_15 = arith.constant 0 : index
    %11 = vector.load %arg14[%c1, %c0_15] : memref<6x256xf32, #tpu.memory_space<vmem>>, vector<4x256xf32>
    tpu.vector_store %arg14[%c1, %c0_15], %10 {strides = array<i32>} : memref<6x256xf32, #tpu.memory_space<vmem>>, vector<4x256xf32>,
    %c0_16 = arith.constant 0 : index
    %c0_17 = arith.constant 0 : index
    %12 = vector.load %arg14[%c0_16, %c0_17] : memref<6x256xf32, #tpu.memory_space<vmem>>, vector<4x256xf32>
    %c1_18 = arith.constant 1 : index
    %c0_19 = arith.constant 0 : index
    %13 = vector.load %arg14[%c1_18, %c0_19] : memref<6x256xf32, #tpu.memory_space<vmem>>, vector<4x256xf32>
    %c2 = arith.constant 2 : index
    %c0_20 = arith.constant 0 : index
    %14 = vector.load %arg14[%c2, %c0_20] : memref<6x256xf32, #tpu.memory_space<vmem>>, vector<4x256xf32>
    %c0_21 = arith.constant 0 : index
    %c0_22 = arith.constant 0 : index
    %c0_23 = arith.constant 0 : index
    %15 = vector.load %arg5[%c0_21, %c0_22, %c0_23] : memref<3x256x128xf32, #tpu.memory_space<vmem>>, vector<1x256x128xf32>
    %16 = vector.shape_cast %15 : vector<1x256x128xf32> to vector<256x128xf32>
    %cst_24 = arith.constant dense<0.000000e+00> : vector<4x128xf32>
    %17 = tpu.matmul %12, %16, %cst_24 {dimension_numbers = #tpu.dot_dimension_numbers<[1], [0], [0], [1], [0, 0, 1, 1], [], []>} : vector<4x256xf32>, vector<256x128xf32>, vector<4x128xf32> -> vector<4x128xf32>
    %c1_25 = arith.constant 1 : index
    %c0_26 = arith.constant 0 : index
    %c0_27 = arith.constant 0 : index
    %18 = vector.load %arg5[%c1_25, %c0_26, %c0_27] : memref<3x256x128xf32, #tpu.memory_space<vmem>>, vector<1x256x128xf32>
    %19 = vector.shape_cast %18 : vector<1x256x128xf32> to vector<256x128xf32>
    %cst_28 = arith.constant dense<0.000000e+00> : vector<4x128xf32>
    %20 = tpu.matmul %13, %19, %cst_28 {dimension_numbers = #tpu.dot_dimension_numbers<[1], [0], [0], [1], [0, 0, 1, 1], [], []>} : vector<4x256xf32>, vector<256x128xf32>, vector<4x128xf32> -> vector<4x128xf32>
    %21 = arith.addf %17, %20 : vector<4x128xf32>
    %c2_29 = arith.constant 2 : index
    %c0_30 = arith.constant 0 : index
    %c0_31 = arith.constant 0 : index
    %22 = vector.load %arg5[%c2_29, %c0_30, %c0_31] : memref<3x256x128xf32, #tpu.memory_space<vmem>>, vector<1x256x128xf32>
    %23 = vector.shape_cast %22 : vector<1x256x128xf32> to vector<256x128xf32>
    %cst_32 = arith.constant dense<0.000000e+00> : vector<4x128xf32>
    %24 = tpu.matmul %14, %23, %cst_32 {dimension_numbers = #tpu.dot_dimension_numbers<[1], [0], [0], [1], [0, 0, 1, 1], [], []>} : vector<4x256xf32>, vector<256x128xf32>, vector<4x128xf32> -> vector<4x128xf32>
    %25 = arith.addf %21, %24 : vector<4x128xf32>
    %c0_33 = arith.constant 0 : index
    %c0_34 = arith.constant 0 : index
    %26 = vector.load %arg6[%c0_33, %c0_34] : memref<1x128xf32, #tpu.memory_space<vmem>>, vector<1x128xf32>
    %27 = vector.broadcast %26 : vector<1x128xf32> to vector<4x128xf32>
    %28 = arith.addf %25, %27 : vector<4x128xf32>
    %c0_35 = arith.constant 0 : index
    %29 = memref.load %arg1[%c0_35] : memref<4xf32, #tpu.memory_space<smem>>
    %cst_36 = arith.constant 0.000000e+00 : f32
    %30 = vector.broadcast %cst_36 : f32 to vector<4x128xf32>
    %31 = arith.cmpf oge, %28, %30 : vector<4x128xf32>
    %32 = vector.broadcast %29 : f32 to vector<4x128xf32>
    %33 = arith.mulf %32, %28 : vector<4x128xf32>
    %34 = arith.select %31, %28, %33 : vector<4x128xi1>, vector<4x128xf32>
    %c1_37 = arith.constant 1 : index
    %c0_38 = arith.constant 0 : index
    %35 = vector.load %arg15[%c1_37, %c0_38] : memref<6x128xf32, #tpu.memory_space<vmem>>, vector<4x128xf32>
    tpu.vector_store %arg15[%c1_37, %c0_38], %34 {strides = array<i32>} : memref<6x128xf32, #tpu.memory_space<vmem>>, vector<4x128xf32>,
    %c0_39 = arith.constant 0 : index
    %c0_40 = arith.constant 0 : index
    %36 = vector.load %arg15[%c0_39, %c0_40] : memref<6x128xf32, #tpu.memory_space<vmem>>, vector<4x128xf32>
    %c1_41 = arith.constant 1 : index
    %c0_42 = arith.constant 0 : index
    %37 = vector.load %arg15[%c1_41, %c0_42] : memref<6x128xf32, #tpu.memory_space<vmem>>, vector<4x128xf32>
    %c2_43 = arith.constant 2 : index
    %c0_44 = arith.constant 0 : index
    %38 = vector.load %arg15[%c2_43, %c0_44] : memref<6x128xf32, #tpu.memory_space<vmem>>, vector<4x128xf32>
    %c0_45 = arith.constant 0 : index
    %c0_46 = arith.constant 0 : index
    %c0_47 = arith.constant 0 : index
    %39 = vector.load %arg7[%c0_45, %c0_46, %c0_47] : memref<3x128x64xf32, #tpu.memory_space<vmem>>, vector<1x128x64xf32>
    %40 = vector.shape_cast %39 : vector<1x128x64xf32> to vector<128x64xf32>
    %cst_48 = arith.constant dense<0.000000e+00> : vector<4x64xf32>
    %41 = tpu.matmul %36, %40, %cst_48 {dimension_numbers = #tpu.dot_dimension_numbers<[1], [0], [0], [1], [0, 0, 1, 1], [], []>} : vector<4x128xf32>, vector<128x64xf32>, vector<4x64xf32> -> vector<4x64xf32>
    %c1_49 = arith.constant 1 : index
    %c0_50 = arith.constant 0 : index
    %c0_51 = arith.constant 0 : index
    %42 = vector.load %arg7[%c1_49, %c0_50, %c0_51] : memref<3x128x64xf32, #tpu.memory_space<vmem>>, vector<1x128x64xf32>
    %43 = vector.shape_cast %42 : vector<1x128x64xf32> to vector<128x64xf32>
    %cst_52 = arith.constant dense<0.000000e+00> : vector<4x64xf32>
    %44 = tpu.matmul %37, %43, %cst_52 {dimension_numbers = #tpu.dot_dimension_numbers<[1], [0], [0], [1], [0, 0, 1, 1], [], []>} : vector<4x128xf32>, vector<128x64xf32>, vector<4x64xf32> -> vector<4x64xf32>
    %45 = arith.addf %41, %44 : vector<4x64xf32>
    %c2_53 = arith.constant 2 : index
    %c0_54 = arith.constant 0 : index
    %c0_55 = arith.constant 0 : index
    %46 = vector.load %arg7[%c2_53, %c0_54, %c0_55] : memref<3x128x64xf32, #tpu.memory_space<vmem>>, vector<1x128x64xf32>
    %47 = vector.shape_cast %46 : vector<1x128x64xf32> to vector<128x64xf32>
    %cst_56 = arith.constant dense<0.000000e+00> : vector<4x64xf32>
    %48 = tpu.matmul %38, %47, %cst_56 {dimension_numbers = #tpu.dot_dimension_numbers<[1], [0], [0], [1], [0, 0, 1, 1], [], []>} : vector<4x128xf32>, vector<128x64xf32>, vector<4x64xf32> -> vector<4x64xf32>
    %49 = arith.addf %45, %48 : vector<4x64xf32>
    %c0_57 = arith.constant 0 : index
    %c0_58 = arith.constant 0 : index
    %50 = vector.load %arg8[%c0_57, %c0_58] : memref<1x64xf32, #tpu.memory_space<vmem>>, vector<1x64xf32>
    %51 = vector.broadcast %50 : vector<1x64xf32> to vector<4x64xf32>
    %52 = arith.addf %49, %51 : vector<4x64xf32>
    %c1_59 = arith.constant 1 : index
    %53 = memref.load %arg1[%c1_59] : memref<4xf32, #tpu.memory_space<smem>>
    %cst_60 = arith.constant 0.000000e+00 : f32
    %54 = vector.broadcast %cst_60 : f32 to vector<4x64xf32>
    %55 = arith.cmpf oge, %52, %54 : vector<4x64xf32>
    %56 = vector.broadcast %53 : f32 to vector<4x64xf32>
    %57 = arith.mulf %56, %52 : vector<4x64xf32>
    %58 = arith.select %55, %52, %57 : vector<4x64xi1>, vector<4x64xf32>
    %c1_61 = arith.constant 1 : index
    %c0_62 = arith.constant 0 : index
    %59 = vector.load %arg16[%c1_61, %c0_62] : memref<6x64xf32, #tpu.memory_space<vmem>>, vector<4x64xf32>
    tpu.vector_store %arg16[%c1_61, %c0_62], %58 {strides = array<i32>} : memref<6x64xf32, #tpu.memory_space<vmem>>, vector<4x64xf32>,
    %c1_63 = arith.constant 1 : index
    %c0_64 = arith.constant 0 : index
    %60 = vector.load %arg16[%c1_63, %c0_64] : memref<6x64xf32, #tpu.memory_space<vmem>>, vector<4x64xf32>
    %c0_65 = arith.constant 0 : index
    %c0_66 = arith.constant 0 : index
    %c0_67 = arith.constant 0 : index
    %61 = vector.load %arg3[%c0_65, %c0_66, %c0_67] : memref<1x4x64xf32, #tpu.memory_space<vmem>>, vector<1x4x64xf32>
    %62 = vector.shape_cast %61 : vector<1x4x64xf32> to vector<4x64xf32>
    %63 = arith.subf %60, %62 : vector<4x64xf32>
    %c1_68 = arith.constant 1 : index
    %c0_69 = arith.constant 0 : index
    %64 = vector.load %arg16[%c1_68, %c0_69] : memref<6x64xf32, #tpu.memory_space<vmem>>, vector<4x64xf32>
    tpu.vector_store %arg16[%c1_68, %c0_69], %63 {strides = array<i32>} : memref<6x64xf32, #tpu.memory_space<vmem>>, vector<4x64xf32>,
    %c0_70 = arith.constant 0 : index
    %c0_71 = arith.constant 0 : index
    %65 = vector.load %arg16[%c0_70, %c0_71] : memref<6x64xf32, #tpu.memory_space<vmem>>, vector<4x64xf32>
    %c1_72 = arith.constant 1 : index
    %c0_73 = arith.constant 0 : index
    %66 = vector.load %arg16[%c1_72, %c0_73] : memref<6x64xf32, #tpu.memory_space<vmem>>, vector<4x64xf32>
    %c2_74 = arith.constant 2 : index
    %c0_75 = arith.constant 0 : index
    %67 = vector.load %arg16[%c2_74, %c0_75] : memref<6x64xf32, #tpu.memory_space<vmem>>, vector<4x64xf32>
    %c0_76 = arith.constant 0 : index
    %c0_77 = arith.constant 0 : index
    %c0_78 = arith.constant 0 : index
    %68 = vector.load %arg9[%c0_76, %c0_77, %c0_78] : memref<3x64x128xf32, #tpu.memory_space<vmem>>, vector<1x64x128xf32>
    %69 = vector.shape_cast %68 : vector<1x64x128xf32> to vector<64x128xf32>
    %cst_79 = arith.constant dense<0.000000e+00> : vector<4x128xf32>
    %70 = tpu.matmul %65, %69, %cst_79 {dimension_numbers = #tpu.dot_dimension_numbers<[1], [0], [0], [1], [0, 0, 1, 1], [], []>} : vector<4x64xf32>, vector<64x128xf32>, vector<4x128xf32> -> vector<4x128xf32>
    %c1_80 = arith.constant 1 : index
    %c0_81 = arith.constant 0 : index
    %c0_82 = arith.constant 0 : index
    %71 = vector.load %arg9[%c1_80, %c0_81, %c0_82] : memref<3x64x128xf32, #tpu.memory_space<vmem>>, vector<1x64x128xf32>
    %72 = vector.shape_cast %71 : vector<1x64x128xf32> to vector<64x128xf32>
    %cst_83 = arith.constant dense<0.000000e+00> : vector<4x128xf32>
    %73 = tpu.matmul %66, %72, %cst_83 {dimension_numbers = #tpu.dot_dimension_numbers<[1], [0], [0], [1], [0, 0, 1, 1], [], []>} : vector<4x64xf32>, vector<64x128xf32>, vector<4x128xf32> -> vector<4x128xf32>
    %74 = arith.addf %70, %73 : vector<4x128xf32>
    %c2_84 = arith.constant 2 : index
    %c0_85 = arith.constant 0 : index
    %c0_86 = arith.constant 0 : index
    %75 = vector.load %arg9[%c2_84, %c0_85, %c0_86] : memref<3x64x128xf32, #tpu.memory_space<vmem>>, vector<1x64x128xf32>
    %76 = vector.shape_cast %75 : vector<1x64x128xf32> to vector<64x128xf32>
    %cst_87 = arith.constant dense<0.000000e+00> : vector<4x128xf32>
    %77 = tpu.matmul %67, %76, %cst_87 {dimension_numbers = #tpu.dot_dimension_numbers<[1], [0], [0], [1], [0, 0, 1, 1], [], []>} : vector<4x64xf32>, vector<64x128xf32>, vector<4x128xf32> -> vector<4x128xf32>
    %78 = arith.addf %74, %77 : vector<4x128xf32>
    %c0_88 = arith.constant 0 : index
    %c0_89 = arith.constant 0 : index
    %79 = vector.load %arg10[%c0_88, %c0_89] : memref<1x128xf32, #tpu.memory_space<vmem>>, vector<1x128xf32>
    %80 = vector.broadcast %79 : vector<1x128xf32> to vector<4x128xf32>
    %81 = arith.addf %78, %80 : vector<4x128xf32>
    %c2_90 = arith.constant 2 : index
    %82 = memref.load %arg1[%c2_90] : memref<4xf32, #tpu.memory_space<smem>>
    %cst_91 = arith.constant 0.000000e+00 : f32
    %83 = vector.broadcast %cst_91 : f32 to vector<4x128xf32>
    %84 = arith.cmpf oge, %81, %83 : vector<4x128xf32>
    %85 = vector.broadcast %82 : f32 to vector<4x128xf32>
    %86 = arith.mulf %85, %81 : vector<4x128xf32>
    %87 = arith.select %84, %81, %86 : vector<4x128xi1>, vector<4x128xf32>
    %c1_92 = arith.constant 1 : index
    %c0_93 = arith.constant 0 : index
    %88 = vector.load %arg15[%c1_92, %c0_93] : memref<6x128xf32, #tpu.memory_space<vmem>>, vector<4x128xf32>
    %89 = arith.addf %87, %88 : vector<4x128xf32>
    %c1_94 = arith.constant 1 : index
    %c0_95 = arith.constant 0 : index
    %90 = vector.load %arg15[%c1_94, %c0_95] : memref<6x128xf32, #tpu.memory_space<vmem>>, vector<4x128xf32>
    tpu.vector_store %arg15[%c1_94, %c0_95], %89 {strides = array<i32>} : memref<6x128xf32, #tpu.memory_space<vmem>>, vector<4x128xf32>,
    %c1_96 = arith.constant 1 : index
    %c0_97 = arith.constant 0 : index
    %91 = vector.load %arg15[%c1_96, %c0_97] : memref<6x128xf32, #tpu.memory_space<vmem>>, vector<4x128xf32>
    %c0_98 = arith.constant 0 : index
    %c0_99 = arith.constant 0 : index
    %c0_100 = arith.constant 0 : index
    %92 = vector.load %arg4[%c0_98, %c0_99, %c0_100] : memref<1x4x128xf32, #tpu.memory_space<vmem>>, vector<1x4x128xf32>
    %93 = vector.shape_cast %92 : vector<1x4x128xf32> to vector<4x128xf32>
    %94 = arith.subf %91, %93 : vector<4x128xf32>
    %c1_101 = arith.constant 1 : index
    %c0_102 = arith.constant 0 : index
    %95 = vector.load %arg15[%c1_101, %c0_102] : memref<6x128xf32, #tpu.memory_space<vmem>>, vector<4x128xf32>
    tpu.vector_store %arg15[%c1_101, %c0_102], %94 {strides = array<i32>} : memref<6x128xf32, #tpu.memory_space<vmem>>, vector<4x128xf32>,
    %c0_103 = arith.constant 0 : index
    %c0_104 = arith.constant 0 : index
    %96 = vector.load %arg15[%c0_103, %c0_104] : memref<6x128xf32, #tpu.memory_space<vmem>>, vector<4x128xf32>
    %c1_105 = arith.constant 1 : index
    %c0_106 = arith.constant 0 : index
    %97 = vector.load %arg15[%c1_105, %c0_106] : memref<6x128xf32, #tpu.memory_space<vmem>>, vector<4x128xf32>
    %c2_107 = arith.constant 2 : index
    %c0_108 = arith.constant 0 : index
    %98 = vector.load %arg15[%c2_107, %c0_108] : memref<6x128xf32, #tpu.memory_space<vmem>>, vector<4x128xf32>
    %c0_109 = arith.constant 0 : index
    %c0_110 = arith.constant 0 : index
    %c0_111 = arith.constant 0 : index
    %99 = vector.load %arg11[%c0_109, %c0_110, %c0_111] : memref<3x128x256xf32, #tpu.memory_space<vmem>>, vector<1x128x256xf32>
    %100 = vector.shape_cast %99 : vector<1x128x256xf32> to vector<128x256xf32>
    %cst_112 = arith.constant dense<0.000000e+00> : vector<4x256xf32>
    %101 = tpu.matmul %96, %100, %cst_112 {dimension_numbers = #tpu.dot_dimension_numbers<[1], [0], [0], [1], [0, 0, 1, 1], [], []>} : vector<4x128xf32>, vector<128x256xf32>, vector<4x256xf32> -> vector<4x256xf32>
    %c1_113 = arith.constant 1 : index
    %c0_114 = arith.constant 0 : index
    %c0_115 = arith.constant 0 : index
    %102 = vector.load %arg11[%c1_113, %c0_114, %c0_115] : memref<3x128x256xf32, #tpu.memory_space<vmem>>, vector<1x128x256xf32>
    %103 = vector.shape_cast %102 : vector<1x128x256xf32> to vector<128x256xf32>
    %cst_116 = arith.constant dense<0.000000e+00> : vector<4x256xf32>
    %104 = tpu.matmul %97, %103, %cst_116 {dimension_numbers = #tpu.dot_dimension_numbers<[1], [0], [0], [1], [0, 0, 1, 1], [], []>} : vector<4x128xf32>, vector<128x256xf32>, vector<4x256xf32> -> vector<4x256xf32>
    %105 = arith.addf %101, %104 : vector<4x256xf32>
    %c2_117 = arith.constant 2 : index
    %c0_118 = arith.constant 0 : index
    %c0_119 = arith.constant 0 : index
    %106 = vector.load %arg11[%c2_117, %c0_118, %c0_119] : memref<3x128x256xf32, #tpu.memory_space<vmem>>, vector<1x128x256xf32>
    %107 = vector.shape_cast %106 : vector<1x128x256xf32> to vector<128x256xf32>
    %cst_120 = arith.constant dense<0.000000e+00> : vector<4x256xf32>
    %108 = tpu.matmul %98, %107, %cst_120 {dimension_numbers = #tpu.dot_dimension_numbers<[1], [0], [0], [1], [0, 0, 1, 1], [], []>} : vector<4x128xf32>, vector<128x256xf32>, vector<4x256xf32> -> vector<4x256xf32>
    %109 = arith.addf %105, %108 : vector<4x256xf32>
    %c0_121 = arith.constant 0 : index
    %c0_122 = arith.constant 0 : index
    %110 = vector.load %arg12[%c0_121, %c0_122] : memref<1x256xf32, #tpu.memory_space<vmem>>, vector<1x256xf32>
    %111 = vector.broadcast %110 : vector<1x256xf32> to vector<4x256xf32>
    %112 = arith.addf %109, %111 : vector<4x256xf32>
    %c3 = arith.constant 3 : index
    %113 = memref.load %arg1[%c3] : memref<4xf32, #tpu.memory_space<smem>>
    %cst_123 = arith.constant 0.000000e+00 : f32
    %114 = vector.broadcast %cst_123 : f32 to vector<4x256xf32>
    %115 = arith.cmpf oge, %112, %114 : vector<4x256xf32>
    %116 = vector.broadcast %113 : f32 to vector<4x256xf32>
    %117 = arith.mulf %116, %112 : vector<4x256xf32>
    %118 = arith.select %115, %112, %117 : vector<4x256xi1>, vector<4x256xf32>
    %c0_124 = arith.constant 0 : index
    %c0_125 = arith.constant 0 : index
    %c0_126 = arith.constant 0 : index
    %119 = vector.load %arg2[%c0_124, %c0_125, %c0_126] : memref<1x4x256xf32, #tpu.memory_space<vmem>>, vector<1x4x256xf32>
    %120 = vector.shape_cast %119 : vector<1x4x256xf32> to vector<4x256xf32>
    %121 = arith.addf %118, %120 : vector<4x256xf32>
    %c0_127 = arith.constant 0 : index
    %c0_128 = arith.constant 0 : index
    %c0_129 = arith.constant 0 : index
    %122 = vector.load %arg13[%c0_127, %c0_128, %c0_129] : memref<1x4x256xf32, #tpu.memory_space<vmem>>, vector<1x4x256xf32>
    %123 = vector.shape_cast %122 : vector<1x4x256xf32> to vector<4x256xf32>
    %124 = vector.shape_cast %121 : vector<4x256xf32> to vector<1x4x256xf32>
    tpu.vector_store %arg13[%c0_127, %c0_128, %c0_129], %124 {strides = array<i32>} : memref<1x4x256xf32, #tpu.memory_space<vmem>>, vector<1x4x256xf32>,
    return
  }
  func.func @transform_0(%arg0: i32) -> i32 {
    %c0_i32 = arith.constant 0 : i32
    %c0_i32_0 = arith.constant 0 : i32
    return %c0_i32 : i32
  }
  func.func @transform_1(%arg0: i32) -> (i32, i32, i32) {
    %c0_i32 = arith.constant 0 : i32
    %c0_i32_0 = arith.constant 0 : i32
    %c0_i32_1 = arith.constant 0 : i32
    return %arg0, %c0_i32, %c0_i32_0 : i32, i32, i32
  }
  func.func @transform_2(%arg0: i32) -> (i32, i32, i32) {
    %c0_i32 = arith.constant 0 : i32
    %c0_i32_0 = arith.constant 0 : i32
    %c0_i32_1 = arith.constant 0 : i32
    return %arg0, %c0_i32, %c0_i32_0 : i32, i32, i32
  }
  func.func @transform_3(%arg0: i32) -> (i32, i32, i32) {
    %c0_i32 = arith.constant 0 : i32
    %c0_i32_0 = arith.constant 0 : i32
    %c0_i32_1 = arith.constant 0 : i32
    return %arg0, %c0_i32, %c0_i32_0 : i32, i32, i32
  }
  func.func @transform_4(%arg0: i32) -> (i32, i32, i32) {
    %c0_i32 = arith.constant 0 : i32
    %c0_i32_0 = arith.constant 0 : i32
    %c0_i32_1 = arith.constant 0 : i32
    %c0_i32_2 = arith.constant 0 : i32
    return %c0_i32, %c0_i32_0, %c0_i32_1 : i32, i32, i32
  }
  func.func @transform_5(%arg0: i32) -> (i32, i32) {
    %c0_i32 = arith.constant 0 : i32
    %c0_i32_0 = arith.constant 0 : i32
    %c0_i32_1 = arith.constant 0 : i32
    return %c0_i32, %c0_i32_0 : i32, i32
  }
  func.func @transform_6(%arg0: i32) -> (i32, i32, i32) {
    %c0_i32 = arith.constant 0 : i32
    %c0_i32_0 = arith.constant 0 : i32
    %c0_i32_1 = arith.constant 0 : i32
    %c0_i32_2 = arith.constant 0 : i32
    return %c0_i32, %c0_i32_0, %c0_i32_1 : i32, i32, i32
  }
  func.func @transform_7(%arg0: i32) -> (i32, i32) {
    %c0_i32 = arith.constant 0 : i32
    %c0_i32_0 = arith.constant 0 : i32
    %c0_i32_1 = arith.constant 0 : i32
    return %c0_i32, %c0_i32_0 : i32, i32
  }
  func.func @transform_8(%arg0: i32) -> (i32, i32, i32) {
    %c0_i32 = arith.constant 0 : i32
    %c0_i32_0 = arith.constant 0 : i32
    %c0_i32_1 = arith.constant 0 : i32
    %c0_i32_2 = arith.constant 0 : i32
    return %c0_i32, %c0_i32_0, %c0_i32_1 : i32, i32, i32
  }
  func.func @transform_9(%arg0: i32) -> (i32, i32) {
    %c0_i32 = arith.constant 0 : i32
    %c0_i32_0 = arith.constant 0 : i32
    %c0_i32_1 = arith.constant 0 : i32
    return %c0_i32, %c0_i32_0 : i32, i32
  }
  func.func @transform_10(%arg0: i32) -> (i32, i32, i32) {
    %c0_i32 = arith.constant 0 : i32
    %c0_i32_0 = arith.constant 0 : i32
    %c0_i32_1 = arith.constant 0 : i32
    %c0_i32_2 = arith.constant 0 : i32
    return %c0_i32, %c0_i32_0, %c0_i32_1 : i32, i32, i32
  }
  func.func @transform_11(%arg0: i32) -> (i32, i32) {
    %c0_i32 = arith.constant 0 : i32
    %c0_i32_0 = arith.constant 0 : i32
    %c0_i32_1 = arith.constant 0 : i32
    return %c0_i32, %c0_i32_0 : i32, i32
  }
  func.func @transform_12(%arg0: i32) -> (i32, i32, i32) {
    %c0_i32 = arith.constant 0 : i32
    %c0_i32_0 = arith.constant 0 : i32
    %c0_i32_1 = arith.constant 0 : i32
    return %arg0, %c0_i32, %c0_i32_0 : i32, i32, i32
  }
}

</mosaic_0001>

<bundles_post_ra>
// kernel: tile.30
= control target key start
LH: loop header
LB: loop body
LE: loop exit
PB: predicated region body
PF: predicated region fallthrough
CT: control target
= control target key end

     0   :  { %s64_s0 = inlined_call_operand.vmem [shape: f32[4], index: 0, kind: input, shape index: {}]   ;;  %s65_s1 = inlined_call_operand.vmem [shape: f32[64,4], index: 1, kind: output, shape index: {}]  }
   0x1   :  { %v4_v0 = vld [vmem:[%s64_s0] ss:$0 sm:$0xff] }
   0x2   :  { %5 = vst [vmem:[%s65_s1] sm:$0xff] %v4_v0  ;;  %20 = vst [vmem:[%s65_s1 + $0x8] sm:$0xff] %v4_v0 }
   0x3   :  { %21 = vst [vmem:[%s65_s1 + $0x10] sm:$0xff] %v4_v0  ;;  %22 = vst [vmem:[%s65_s1 + $0x18] sm:$0xff] %v4_v0 }
   0x4   :  { %23 = vst [vmem:[%s65_s1 + $0x20] sm:$0xff] %v4_v0  ;;  %24 = vst [vmem:[%s65_s1 + $0x28] sm:$0xff] %v4_v0 }
   0x5   :  { %25 = vst [vmem:[%s65_s1 + $0x30] sm:$0xff] %v4_v0  ;;  %26 = vst [vmem:[%s65_s1 + $0x38] sm:$0xff] %v4_v0 }

// kernel: tile.31
= control target key start
LH: loop header
LB: loop body
LE: loop exit
PB: predicated region body
PF: predicated region fallthrough
CT: control target
= control target key end

     0   :  { %vm5_vm0 = vcmask 1041409   ;;  %s425_s14 = smov 124   ;;  %s426_s21 = smov 116   ;;  %vm7_vm1 = vcmask 31744   ;;  %vm17_vm2 = vcmask 1048544   ;;  %vm27_vm3 = vcmask 1015744   ;;  %s696_s0 = inlined_call_operand.vmem [shape: f32[64,4], index: 0, kind: input, shape index: {}]   ;;  %s697_s1 = inlined_call_operand.vmem [shape: f32[1,256], index: 1, kind: output, shape index: {}]  }
   0x1   :  { %v331_v0 = vld [vmem:[%s696_s0 + $0x1f] sm:$0x1]   ;;  %v335_v3 = vld [vmem:[%s696_s0 + $0x1d] sm:$0x1]   ;;  %v333_v6 = vld [vmem:[%s696_s0 + $0x1e] sm:$0x1]  }
   0x2   :  { %v332_v1 = vld [vmem:[%s696_s0 + $0x3e] sm:$0x2]   ;;  %v336_v4 = vld [vmem:[%s696_s0 + $0x3c] sm:$0x2]   ;;  %v334_v7 = vld [vmem:[%s696_s0 + $0x3d] sm:$0x2]  }
   0x3   :  { %v14_v2 = vsel %vm5_vm0, %v332_v1, %v331_v0  ;;  %v34_v5 = vsel %vm5_vm0, %v336_v4, %v335_v3  ;;  %v337_v8 = vld [vmem:[%s696_s0 + $0x1c] sm:$0x1]   ;;  %v24_v9 = vsel %vm5_vm0, %v334_v7, %v333_v6  ;;  %v339_v12 = vld [vmem:[%s696_s0 + $0x1b] sm:$0x1]   ;;  %v341_v14 = vld [vmem:[%s696_s0 + $0x1a] sm:$0x1]  }
   0x4   :  { %15 = vrot.lane.b32.xlu0 %v14_v2, %s425_s14  ;;  %35 = vrot.lane.b32.xlu1 %v34_v5, %s426_s21  ;;  %v338_v10 = vld [vmem:[%s696_s0 + $0x3b] sm:$0x2]   ;;  %v340_v13 = vld [vmem:[%s696_s0 + $0x3a] sm:$0x2]   ;;  %s427_s3 = smov 120   ;;  %s428_s4 = smov 112  }
   0x5   :  { %v44_v11 = vsel %vm5_vm0, %v338_v10, %v337_v8  ;;  %v342_v15 = vld [vmem:[%s696_s0 + $0x39] sm:$0x2]   ;;  %v54_v16 = vsel %vm5_vm0, %v340_v13, %v339_v12  ;;  %v343_v18 = vld [vmem:[%s696_s0 + $0x19] sm:$0x1]   ;;  %v345_v20 = vld [vmem:[%s696_s0 + $0x18] sm:$0x1]  }
   0x6   :  { %v64_v17 = vsel %vm5_vm0, %v342_v15, %v341_v14  ;;  %v344_v19 = vld [vmem:[%s696_s0 + $0x38] sm:$0x2]   ;;  %v346_v21 = vld [vmem:[%s696_s0 + $0x37] sm:$0x2]   ;;  %s429_s13 = smov 108   ;;  %s430_s14 = smov 104  }
   0x7   :  { %v74_v22 = vsel %vm5_vm0, %v344_v19, %v343_v18  ;;  %v84_v23 = vsel %vm5_vm0, %v346_v21, %v345_v20  ;;  %v347_v24 = vld [vmem:[%s696_s0 + $0x17] sm:$0x1]   ;;  %v349_v26 = vld [vmem:[%s696_s0 + $0x16] sm:$0x1]   ;;  %s431_s23 = smov 100   ;;  %s432_s24 = smov 96  }
   0x8   :  { %25 = vrot.lane.b32.xlu0 %v24_v9, %s427_s3  ;;  %45 = vrot.lane.b32.xlu1 %v44_v11, %s428_s4  ;;  %v348_v25 = vld [vmem:[%s696_s0 + $0x36] sm:$0x2]   ;;  %v350_v27 = vld [vmem:[%s696_s0 + $0x35] sm:$0x2]   ;;  %s433_s4 = smov 92   ;;  %s434_s5 = smov 88  }
   0x9   :  { %v94_v28 = vsel %vm5_vm0, %v348_v25, %v347_v24  ;;  %v104_v29 = vsel %vm5_vm0, %v350_v27, %v349_v26  ;;  %v351_v30 = vld [vmem:[%s696_s0 + $0x15] sm:$0x1]   ;;  %v353_v32 = vld [vmem:[%s696_s0 + $0x14] sm:$0x1]   ;;  %v355_v36 = vld [vmem:[%s696_s0 + $0x13] sm:$0x1]  }
   0xa   :  { %v352_v31 = vld [vmem:[%s696_s0 + $0x34] sm:$0x2]   ;;  %v354_v33 = vld [vmem:[%s696_s0 + $0x33] sm:$0x2]   ;;  %v356_v37 = vld [vmem:[%s696_s0 + $0x32] sm:$0x2]  }
   0xb   :  { %v114_v34 = vsel %vm5_vm0, %v352_v31, %v351_v30  ;;  %v124_v35 = vsel %vm5_vm0, %v354_v33, %v353_v32  ;;  %v357_v38 = vld [vmem:[%s696_s0 + $0x12] sm:$0x1]   ;;  %s436_s15 = smov 80   ;;  %v134_v40 = vsel %vm5_vm0, %v356_v37, %v355_v36  ;;  %v359_v42 = vld [vmem:[%s696_s0 + $0x11] sm:$0x1]   ;;  %s438_s29 = smov 72  }
   0xc   :  { %55 = vrot.lane.b32.xlu0 %v54_v16, %s429_s13  ;;  %65 = vrot.lane.b32.xlu1 %v64_v17, %s430_s14  ;;  %v358_v39 = vld [vmem:[%s696_s0 + $0x31] sm:$0x2]   ;;  %s435_s14 = smov 84   ;;  %v360_v43 = vld [vmem:[%s696_s0 + $0x30] sm:$0x2]   ;;  %s439_s9 = smov 68  }
   0xd   :  { %v144_v41 = vsel %vm5_vm0, %v358_v39, %v357_v38  ;;  %v361_v44 = vld [vmem:[%s696_s0 + $0x10] sm:$0x1]   ;;  %v2_v46 = vld [vmem:[%s696_s0] sm:$0x1]   ;;  %v154_v48 = vsel %vm5_vm0, %v360_v43, %v359_v42  ;;  %v363_v51 = vld [vmem:[%s696_s0 + $0xf] sm:$0x1]  }
   0xe   :  { %v362_v45 = vld [vmem:[%s696_s0 + $0x2f] sm:$0x2]   ;;  %v330_v47 = vld [vmem:[%s696_s0 + $0x1f] sm:$0x2]   ;;  %v364_v52 = vld [vmem:[%s696_s0 + $0x2e] sm:$0x2]  }
   0xf   :  { %v6_v49 = vsel %vm5_vm0, %v330_v47, %v2_v46  ;;  %v164_v50 = vsel %vm5_vm0, %v362_v45, %v361_v44  ;;  %v365_v53 = vld [vmem:[%s696_s0 + $0xe] sm:$0x1]   ;;  %s440_s10 = smov 64   ;;  %v174_v55 = vsel %vm5_vm0, %v364_v52, %v363_v51  ;;  %v367_v57 = vld [vmem:[%s696_s0 + $0xd] sm:$0x1]   ;;  %s441_s19 = smov 60  }
  0x10   :  { %75 = vrot.lane.b32.xlu0 %v74_v22, %s431_s23  ;;  %85 = vrot.lane.b32.xlu1 %v84_v23, %s432_s24  ;;  %s437_s24 = smov 76   ;;  %8 = vst.msk [vmem:[#allocation0] ss:$8 sm:$0x3] %vm7_vm1, %v6_v49   ;;  %v366_v54 = vld [vmem:[%s696_s0 + $0x2d] sm:$0x2]  }
  0x11   :  { %v184_v56 = vsel %vm5_vm0, %v366_v54, %v365_v53  ;;  %v368_v58 = vld [vmem:[%s696_s0 + $0x2c] sm:$0x2]   ;;  %v369_v59 = vld [vmem:[%s696_s0 + $0xc] sm:$0x1]   ;;  %s442_s20 = smov 56   ;;  %s444_s30 = smov 48  }
  0x12   :  { %v370_v60 = vld [vmem:[%s696_s0 + $0x2b] sm:$0x2]   ;;  %v194_v61 = vsel %vm5_vm0, %v368_v58, %v367_v57  ;;  %v371_v63 = vld [vmem:[%s696_s0 + $0xb] sm:$0x1]   ;;  %v373_v1 = vld [vmem:[%s696_s0 + $0xa] sm:$0x1]  }
  0x13   :  { %v204_v62 = vsel %vm5_vm0, %v370_v60, %v369_v59  ;;  %v372_v0 = vld [vmem:[%s696_s0 + $0x2a] sm:$0x2]   ;;  %v374_v2 = vld [vmem:[%s696_s0 + $0x29] sm:$0x2]   ;;  %v375_v5 = vld [vmem:[%s696_s0 + $0x9] sm:$0x1]  }
  0x14   :  { %95 = vrot.lane.b32.xlu0 %v94_v28, %s433_s4  ;;  %105 = vrot.lane.b32.xlu1 %v104_v29, %s434_s5  ;;  %v214_v3 = vsel %vm5_vm0, %v372_v0, %v371_v63  ;;  %v224_v4 = vsel %vm5_vm0, %v374_v2, %v373_v1  ;;  %v376_v6 = vld [vmem:[%s696_s0 + $0x28] sm:$0x2]   ;;  %v377_v7 = vld [vmem:[%s696_s0 + $0x8] sm:$0x1]   ;;  %s446_s11 = smov 40   ;;  %s448_s21 = smov 32  }
  0x15   :  { %v378_v8 = vld [vmem:[%s696_s0 + $0x27] sm:$0x2]   ;;  %v234_v9 = vsel %vm5_vm0, %v376_v6, %v375_v5  ;;  %v379_v11 = vld [vmem:[%s696_s0 + $0x7] sm:$0x1]   ;;  %v381_v13 = vld [vmem:[%s696_s0 + $0x6] sm:$0x1]  }
  0x16   :  { %v244_v10 = vsel %vm5_vm0, %v378_v8, %v377_v7  ;;  %v380_v12 = vld [vmem:[%s696_s0 + $0x26] sm:$0x2]   ;;  %v382_v14 = vld [vmem:[%s696_s0 + $0x25] sm:$0x2]   ;;  %v383_v17 = vld [vmem:[%s696_s0 + $0x5] sm:$0x1]  }
  0x17   :  { %v254_v15 = vsel %vm5_vm0, %v380_v12, %v379_v11  ;;  %v264_v16 = vsel %vm5_vm0, %v382_v14, %v381_v13  ;;  %v384_v18 = vld [vmem:[%s696_s0 + $0x24] sm:$0x2]   ;;  %v385_v19 = vld [vmem:[%s696_s0 + $0x4] sm:$0x1]   ;;  %s450_s2 = smov 24   ;;  %s452_s12 = smov 16  }
  0x18   :  { %115 = vrot.lane.b32.xlu0 %v114_v34, %s435_s14  ;;  %125 = vrot.lane.b32.xlu1 %v124_v35, %s436_s15  ;;  %v386_v20 = vld [vmem:[%s696_s0 + $0x23] sm:$0x2]   ;;  %v274_v21 = vsel %vm5_vm0, %v384_v18, %v383_v17  ;;  %v387_v23 = vld [vmem:[%s696_s0 + $0x3] sm:$0x1]   ;;  %s454_s17 = smov 8   ;;  %s455_s18 = smov 4  }
  0x19   :  { %v284_v22 = vsel %vm5_vm0, %v386_v20, %v385_v19  ;;  %v388_v24 = vld [vmem:[%s696_s0 + $0x22] sm:$0x2]   ;;  %v389_v25 = vld [vmem:[%s696_s0 + $0x2] sm:$0x1]   ;;  %v391_v29 = vld [vmem:[%s696_s0 + $0x1] sm:$0x1]  }
  0x1a   :  { %v390_v26 = vld [vmem:[%s696_s0 + $0x21] sm:$0x2]   ;;  %v294_v27 = vsel %vm5_vm0, %v388_v24, %v387_v23  ;;  %v392_v30 = vld [vmem:[%s696_s0 + $0x20] sm:$0x2]   ;;  %s453_s0 = smov 12   ;;  %vm37_vm4 = vcmask 982944  }
  0x1b   :  { %v304_v28 = vsel %vm5_vm0, %v390_v26, %v389_v25  ;;  %v314_v31 = vsel %vm5_vm0, %v392_v30, %v391_v29  ;;  %vm47_vm5 = vcmask 950144   ;;  %vm57_vm6 = vcmask 917344  }
  0x1c   :  { %135 = vrot.lane.b32.xlu0 %v134_v40, %s437_s24  ;;  %145 = vrot.lane.b32.xlu1 %v144_v41, %s438_s29  ;;  %s443_s29 = smov 52   ;;  %vm67_vm7 = vcmask 884544   ;;  %vm77_vm8 = vcmask 851744   ;;  %vm87_vm9 = vcmask 818944   ;;  %vm97_vm10 = vcmask 786144  }
  0x1d   :  { %vm107_vm11 = vcmask 753344   ;;  %vm117_vm12 = vcmask 720544   ;;  %vm127_vm13 = vcmask 687744   ;;  %vm137_vm14 = vcmask 654944  }
  0x1e   :  { %vm147_vm15 = vcmask 622144   ;;  %vm157_vm0 = vcmask 589344   ;;  %vm167_vm1 = vcmask 556544  }
  0x20   :  { %155 = vrot.lane.b32.xlu0 %v154_v48, %s439_s9  ;;  %165 = vrot.lane.b32.xlu1 %v164_v50, %s440_s10  ;;  %s445_s10 = smov 44  }
  0x24   :  { %175 = vrot.lane.b32.xlu0 %v174_v55, %s441_s19  ;;  %185 = vrot.lane.b32.xlu1 %v184_v56, %s442_s20  ;;  %s447_s20 = smov 36  }
  0x28   :  { %195 = vrot.lane.b32.xlu0 %v194_v61, %s443_s29  ;;  %205 = vrot.lane.b32.xlu1 %v204_v62, %s444_s30  ;;  %s449_s30 = smov 28  }
  0x2c   :  { %215 = vrot.lane.b32.xlu0 %v214_v3, %s445_s10  ;;  %225 = vrot.lane.b32.xlu1 %v224_v4, %s446_s11  ;;  %s451_s11 = smov 20  }
  0x30   :  { %235 = vrot.lane.b32.xlu0 %v234_v9, %s447_s20  ;;  %245 = vrot.lane.b32.xlu1 %v244_v10, %s448_s21 }
  0x34   :  { %255 = vrot.lane.b32.xlu0 %v254_v15, %s449_s30  ;;  %265 = vrot.lane.b32.xlu1 %v264_v16, %s450_s2 }
  0x38   :  { %275 = vrot.lane.b32.xlu0 %v274_v21, %s451_s11  ;;  %285 = vrot.lane.b32.xlu1 %v284_v22, %s452_s12 }
  0x3c   :  { %295 = vrot.lane.b32.xlu0 %v294_v27, %s453_s0  ;;  %305 = vrot.lane.b32.xlu1 %v304_v28, %s454_s17 }
  0x40   :  { %315 = vrot.lane.b32.xlu0 %v314_v31, %s455_s18 }
  0x76   :  { %v16_v32 = vpop.permute.xlu0 %15   ;;  %v36_v33 = vpop.permute.xlu1 %35  }
  0x77   :  { %18 = vst.msk [vmem:[#allocation0] ss:$8 sm:$0x3] %vm17_vm2, %v16_v32   ;;  %vm177_vm2 = vcmask 523744  }
  0x7a   :  { %v26_v34 = vpop.permute.xlu0 %25   ;;  %v46_v35 = vpop.permute.xlu1 %45  }
  0x7b   :  { %28 = vst.msk [vmem:[#allocation0] ss:$8 sm:$0x3] %vm27_vm3, %v26_v34   ;;  %vm187_vm3 = vcmask 490944  }
  0x7c   :  { %38 = vst.msk [vmem:[#allocation0] ss:$8 sm:$0x3] %vm37_vm4, %v36_v33   ;;  %vm197_vm4 = vcmask 458144  }
  0x7d   :  { %48 = vst.msk [vmem:[#allocation0] ss:$8 sm:$0x3] %vm47_vm5, %v46_v35   ;;  %vm207_vm5 = vcmask 425344  }
  0x7e   :  { %v56_v36 = vpop.permute.xlu0 %55   ;;  %v66_v37 = vpop.permute.xlu1 %65  }
  0x7f   :  { %58 = vst.msk [vmem:[#allocation0] ss:$8 sm:$0x3] %vm57_vm6, %v56_v36   ;;  %vm217_vm6 = vcmask 392544  }
  0x80   :  { %68 = vst.msk [vmem:[#allocation0] ss:$8 sm:$0x3] %vm67_vm7, %v66_v37   ;;  %vm227_vm7 = vcmask 359744  }
  0x82   :  { %v76_v38 = vpop.permute.xlu0 %75   ;;  %v86_v39 = vpop.permute.xlu1 %85  }
  0x83   :  { %78 = vst.msk [vmem:[#allocation0] ss:$8 sm:$0x3] %vm77_vm8, %v76_v38   ;;  %vm237_vm8 = vcmask 326944  }
  0x84   :  { %88 = vst.msk [vmem:[#allocation0] ss:$8 sm:$0x3] %vm87_vm9, %v86_v39   ;;  %vm247_vm9 = vcmask 294144  }
  0x86   :  { %v96_v40 = vpop.permute.xlu0 %95   ;;  %v106_v41 = vpop.permute.xlu1 %105  }
  0x87   :  { %98 = vst.msk [vmem:[#allocation0] ss:$8 sm:$0x3] %vm97_vm10, %v96_v40   ;;  %vm257_vm10 = vcmask 261344  }
  0x88   :  { %108 = vst.msk [vmem:[#allocation0] ss:$8 sm:$0x3] %vm107_vm11, %v106_v41   ;;  %vm267_vm11 = vcmask 228544  }
  0x8a   :  { %v116_v42 = vpop.permute.xlu0 %115   ;;  %v126_v43 = vpop.permute.xlu1 %125  }
  0x8b   :  { %118 = vst.msk [vmem:[#allocation0] ss:$8 sm:$0x3] %vm117_vm12, %v116_v42   ;;  %vm277_vm12 = vcmask 195744  }
  0x8c   :  { %128 = vst.msk [vmem:[#allocation0] ss:$8 sm:$0x3] %vm127_vm13, %v126_v43   ;;  %vm287_vm13 = vcmask 162944  }
  0x8e   :  { %v136_v44 = vpop.permute.xlu0 %135   ;;  %v146_v45 = vpop.permute.xlu1 %145  }
  0x8f   :  { %138 = vst.msk [vmem:[#allocation0] ss:$8 sm:$0x3] %vm137_vm14, %v136_v44   ;;  %vm297_vm14 = vcmask 130144  }
  0x90   :  { %148 = vst.msk [vmem:[#allocation0] ss:$8 sm:$0x3] %vm147_vm15, %v146_v45   ;;  %vm307_vm15 = vcmask 97344  }
  0x92   :  { %v156_v46 = vpop.permute.xlu0 %155   ;;  %v166_v47 = vpop.permute.xlu1 %165  }
  0x93   :  { %158 = vst.msk [vmem:[#allocation0] ss:$8 sm:$0x3] %vm157_vm0, %v156_v46   ;;  %vm317_vm0 = vcmask 64544  }
  0x94   :  { %168 = vst.msk [vmem:[#allocation0] ss:$8 sm:$0x3] %vm167_vm1, %v166_v47  }
  0x96   :  { %v176_v48 = vpop.permute.xlu0 %175   ;;  %v186_v49 = vpop.permute.xlu1 %185  }
  0x97   :  { %178 = vst.msk [vmem:[#allocation0] ss:$8 sm:$0x3] %vm177_vm2, %v176_v48  }
  0x98   :  { %188 = vst.msk [vmem:[#allocation0] ss:$8 sm:$0x3] %vm187_vm3, %v186_v49  }
  0x9a   :  { %v196_v50 = vpop.permute.xlu0 %195   ;;  %v206_v51 = vpop.permute.xlu1 %205  }
  0x9b   :  { %198 = vst.msk [vmem:[#allocation0] ss:$8 sm:$0x3] %vm197_vm4, %v196_v50  }
  0x9c   :  { %208 = vst.msk [vmem:[#allocation0] ss:$8 sm:$0x3] %vm207_vm5, %v206_v51  }
  0x9e   :  { %v216_v52 = vpop.permute.xlu0 %215   ;;  %v226_v53 = vpop.permute.xlu1 %225  }
  0x9f   :  { %218 = vst.msk [vmem:[#allocation0] ss:$8 sm:$0x3] %vm217_vm6, %v216_v52  }
  0xa0   :  { %228 = vst.msk [vmem:[#allocation0] ss:$8 sm:$0x3] %vm227_vm7, %v226_v53  }
  0xa2   :  { %v236_v54 = vpop.permute.xlu0 %235   ;;  %v246_v55 = vpop.permute.xlu1 %245  }
  0xa3   :  { %238 = vst.msk [vmem:[#allocation0] ss:$8 sm:$0x3] %vm237_vm8, %v236_v54  }
  0xa4   :  { %248 = vst.msk [vmem:[#allocation0] ss:$8 sm:$0x3] %vm247_vm9, %v246_v55  }
  0xa6   :  { %v256_v56 = vpop.permute.xlu0 %255   ;;  %v266_v57 = vpop.permute.xlu1 %265  }
  0xa7   :  { %258 = vst.msk [vmem:[#allocation0] ss:$8 sm:$0x3] %vm257_vm10, %v256_v56  }
  0xa8   :  { %268 = vst.msk [vmem:[#allocation0] ss:$8 sm:$0x3] %vm267_vm11, %v266_v57  }
  0xaa   :  { %v276_v58 = vpop.permute.xlu0 %275   ;;  %v286_v59 = vpop.permute.xlu1 %285  }
  0xab   :  { %278 = vst.msk [vmem:[#allocation0] ss:$8 sm:$0x3] %vm277_vm12, %v276_v58  }
  0xac   :  { %288 = vst.msk [vmem:[#allocation0] ss:$8 sm:$0x3] %vm287_vm13, %v286_v59  }
  0xae   :  { %v296_v60 = vpop.permute.xlu0 %295   ;;  %v306_v61 = vpop.permute.xlu1 %305  }
  0xaf   :  { %298 = vst.msk [vmem:[#allocation0] ss:$8 sm:$0x3] %vm297_vm14, %v296_v60  }
  0xb0   :  { %308 = vst.msk [vmem:[#allocation0] ss:$8 sm:$0x3] %vm307_vm15, %v306_v61  }
  0xb2   :  { %v316_v62 = vpop.permute.xlu0 %315  }
  0xb3   :  { %318 = vst.msk [vmem:[#allocation0] ss:$8 sm:$0x3] %vm317_vm0, %v316_v62  }
  0xba   :  { %v322_v63 = vld [vmem:[#allocation0] sm:$0x1]  ;;  %v326_v0 = vld [vmem:[#allocation0 + $0x8] sm:$0x1] }
  0xbb   :  { %324 = vst [vmem:[%s697_s1] sm:$0x1] %v322_v63  ;;  %393 = vst [vmem:[%s697_s1 + $0x1] sm:$0x1] %v326_v0 }

// kernel: tile.18
= control target key start
LH: loop header
LB: loop body
LE: loop exit
PB: predicated region body
PF: predicated region fallthrough
CT: control target
= control target key end

     0   :  { %s28_s0 = inlined_call_operand.vmem [shape: f32[8], index: 0, kind: input, shape index: {}]   ;;  %s29_s1 = inlined_call_operand.vmem [shape: f32[16,8], index: 1, kind: output, shape index: {}]  }
   0x1   :  { %v4_v0 = vld [vmem:[%s28_s0] ss:$0 sm:$0xff] }
   0x2   :  { %5 = vst [vmem:[%s29_s1] sm:$0xff] %v4_v0  ;;  %8 = vst [vmem:[%s29_s1 + $0x8] sm:$0xff] %v4_v0 }

// kernel: tile.19
= control target key start
LH: loop header
LB: loop body
LE: loop exit
PB: predicated region body
PF: predicated region fallthrough
CT: control target
= control target key end

     0   :  { %s131_s10 = smov 120   ;;  %s132_s11 = smov 104   ;;  %vm3_vm0 = vcmask 64512   ;;  %vm9_vm1 = vcmask 1048512   ;;  %vm15_vm2 = vcmask 982912   ;;  %vm21_vm3 = vcmask 917312   ;;  %s207_s0 = inlined_call_operand.vmem [shape: f32[16,8], index: 0, kind: input, shape index: {}]   ;;  %s208_s1 = inlined_call_operand.vmem [shape: f32[1,128], index: 1, kind: output, shape index: {}]  }
   0x1   :  { %v101_v0 = vld [vmem:[%s207_s0 + $0xf] sm:$0x1]   ;;  %v103_v1 = vld [vmem:[%s207_s0 + $0xd] sm:$0x1]   ;;  %v102_v2 = vld [vmem:[%s207_s0 + $0xe] sm:$0x1]  }
   0x2   :  { %7 = vrot.lane.b32.xlu0 %v101_v0, %s131_s10  ;;  %19 = vrot.lane.b32.xlu1 %v103_v1, %s132_s11  ;;  %v104_v3 = vld [vmem:[%s207_s0 + $0xc] sm:$0x1]   ;;  %s133_s16 = smov 112   ;;  %s134_s17 = smov 96   ;;  %v105_v4 = vld [vmem:[%s207_s0 + $0xb] sm:$0x1]  }
   0x3   :  { %v106_v5 = vld [vmem:[%s207_s0 + $0xa] sm:$0x1]   ;;  %v2_v6 = vld [vmem:[%s207_s0] sm:$0x1]   ;;  %s135_s24 = smov 88   ;;  %s136_s25 = smov 80  }
   0x4   :  { %4 = vst.msk [vmem:[#allocation0] sm:$0x1] %vm3_vm0, %v2_v6   ;;  %v107_v7 = vld [vmem:[%s207_s0 + $0x9] sm:$0x1]   ;;  %v108_v8 = vld [vmem:[%s207_s0 + $0x8] sm:$0x1]  }
   0x5   :  { %s137_s30 = smov 72   ;;  %s138_s2 = smov 64   ;;  %v109_v9 = vld [vmem:[%s207_s0 + $0x7] sm:$0x1]   ;;  %v110_v10 = vld [vmem:[%s207_s0 + $0x6] sm:$0x1]  }
   0x6   :  { %13 = vrot.lane.b32.xlu0 %v102_v2, %s133_s16  ;;  %25 = vrot.lane.b32.xlu1 %v104_v3, %s134_s17  ;;  %s139_s7 = smov 56   ;;  %s140_s8 = smov 48   ;;  %v111_v11 = vld [vmem:[%s207_s0 + $0x5] sm:$0x1]   ;;  %v112_v12 = vld [vmem:[%s207_s0 + $0x4] sm:$0x1]  }
   0x7   :  { %s141_s13 = smov 40   ;;  %s142_s14 = smov 32   ;;  %v113_v13 = vld [vmem:[%s207_s0 + $0x3] sm:$0x1]   ;;  %v114_v14 = vld [vmem:[%s207_s0 + $0x2] sm:$0x1]  }
   0x8   :  { %s143_s19 = smov 24   ;;  %s144_s20 = smov 16   ;;  %v115_v15 = vld [vmem:[%s207_s0 + $0x1] sm:$0x1]   ;;  %vm27_vm4 = vcmask 851712   ;;  %vm33_vm5 = vcmask 786112  }
   0x9   :  { %s145_s0 = smov 8   ;;  %vm39_vm6 = vcmask 720512   ;;  %vm45_vm7 = vcmask 654912   ;;  %vm51_vm8 = vcmask 589312   ;;  %vm57_vm9 = vcmask 523712  }
   0xa   :  { %31 = vrot.lane.b32.xlu0 %v105_v4, %s135_s24  ;;  %37 = vrot.lane.b32.xlu1 %v106_v5, %s136_s25  ;;  %vm63_vm10 = vcmask 458112   ;;  %vm69_vm11 = vcmask 392512   ;;  %vm75_vm12 = vcmask 326912   ;;  %vm81_vm13 = vcmask 261312  }
   0xb   :  { %vm87_vm14 = vcmask 195712   ;;  %vm93_vm15 = vcmask 130112  }
   0xe   :  { %43 = vrot.lane.b32.xlu0 %v107_v7, %s137_s30  ;;  %49 = vrot.lane.b32.xlu1 %v108_v8, %s138_s2 }
  0x12   :  { %55 = vrot.lane.b32.xlu0 %v109_v9, %s139_s7  ;;  %61 = vrot.lane.b32.xlu1 %v110_v10, %s140_s8 }
  0x16   :  { %67 = vrot.lane.b32.xlu0 %v111_v11, %s141_s13  ;;  %73 = vrot.lane.b32.xlu1 %v112_v12, %s142_s14 }
  0x1a   :  { %79 = vrot.lane.b32.xlu0 %v113_v13, %s143_s19  ;;  %85 = vrot.lane.b32.xlu1 %v114_v14, %s144_s20 }
  0x1e   :  { %91 = vrot.lane.b32.xlu0 %v115_v15, %s145_s0 }
  0x74   :  { %v8_v16 = vpop.permute.xlu0 %7   ;;  %v20_v17 = vpop.permute.xlu1 %19  }
  0x75   :  { %10 = vst.msk [vmem:[#allocation0] sm:$0x1] %vm9_vm1, %v8_v16  }
  0x78   :  { %v14_v18 = vpop.permute.xlu0 %13   ;;  %v26_v19 = vpop.permute.xlu1 %25  }
  0x79   :  { %16 = vst.msk [vmem:[#allocation0] sm:$0x1] %vm15_vm2, %v14_v18  }
  0x7a   :  { %22 = vst.msk [vmem:[#allocation0] sm:$0x1] %vm21_vm3, %v20_v17  }
  0x7b   :  { %28 = vst.msk [vmem:[#allocation0] sm:$0x1] %vm27_vm4, %v26_v19  }
  0x7c   :  { %v32_v20 = vpop.permute.xlu0 %31   ;;  %v38_v21 = vpop.permute.xlu1 %37  }
  0x7d   :  { %34 = vst.msk [vmem:[#allocation0] sm:$0x1] %vm33_vm5, %v32_v20  }
  0x7e   :  { %40 = vst.msk [vmem:[#allocation0] sm:$0x1] %vm39_vm6, %v38_v21  }
  0x80   :  { %v44_v22 = vpop.permute.xlu0 %43   ;;  %v50_v23 = vpop.permute.xlu1 %49  }
  0x81   :  { %46 = vst.msk [vmem:[#allocation0] sm:$0x1] %vm45_vm7, %v44_v22  }
  0x82   :  { %52 = vst.msk [vmem:[#allocation0] sm:$0x1] %vm51_vm8, %v50_v23  }
  0x84   :  { %v56_v24 = vpop.permute.xlu0 %55   ;;  %v62_v25 = vpop.permute.xlu1 %61  }
  0x85   :  { %58 = vst.msk [vmem:[#allocation0] sm:$0x1] %vm57_vm9, %v56_v24  }
  0x86   :  { %64 = vst.msk [vmem:[#allocation0] sm:$0x1] %vm63_vm10, %v62_v25  }
  0x88   :  { %v68_v26 = vpop.permute.xlu0 %67   ;;  %v74_v27 = vpop.permute.xlu1 %73  }
  0x89   :  { %70 = vst.msk [vmem:[#allocation0] sm:$0x1] %vm69_vm11, %v68_v26  }
  0x8a   :  { %76 = vst.msk [vmem:[#allocation0] sm:$0x1] %vm75_vm12, %v74_v27  }
  0x8c   :  { %v80_v28 = vpop.permute.xlu0 %79   ;;  %v86_v29 = vpop.permute.xlu1 %85  }
  0x8d   :  { %82 = vst.msk [vmem:[#allocation0] sm:$0x1] %vm81_vm13, %v80_v28  }
  0x8e   :  { %88 = vst.msk [vmem:[#allocation0] sm:$0x1] %vm87_vm14, %v86_v29  }
  0x90   :  { %v92_v30 = vpop.permute.xlu0 %91  }
  0x91   :  { %94 = vst.msk [vmem:[#allocation0] sm:$0x1] %vm93_vm15, %v92_v30  }
  0x98   :  { %v98_v31 = vld [vmem:[#allocation0] sm:$0x1] }
  0x99   :  { %100 = vst [vmem:[%s208_s1] sm:$0x1] %v98_v31 }

// kernel: tile.22
= control target key start
LH: loop header
LB: loop body
LE: loop exit
PB: predicated region body
PF: predicated region fallthrough
CT: control target
= control target key end

     0   :  { %s22_s0 = inlined_call_operand.vmem [shape: f32[16], index: 0, kind: input, shape index: {}]   ;;  %s23_s1 = inlined_call_operand.vmem [shape: f32[4,16], index: 1, kind: output, shape index: {}]  }
   0x1   :  { %v4_v0 = vld [vmem:[%s22_s0] ss:$0 sm:$0xff] }
   0x2   :  { %5 = vst [vmem:[%s23_s1] sm:$0xf] %v4_v0 }

// kernel: tile.23
= control target key start
LH: loop header
LB: loop body
LE: loop exit
PB: predicated region body
PF: predicated region fallthrough
CT: control target
= control target key end

     0   :  { %vm7_vm0 = vcmask 130048   ;;  %s37_s8 = smov 16   ;;  %s38_s9 = smov 32   ;;  %vm13_vm1 = vcmask 523648   ;;  %vm19_vm2 = vcmask 392448   ;;  %vm25_vm3 = vcmask 261248   ;;  %s55_s0 = inlined_call_operand.vmem [shape: f32[4,16], index: 0, kind: input, shape index: {}]   ;;  %s56_s1 = inlined_call_operand.vmem [shape: f32[1,64], index: 1, kind: output, shape index: {}]  }
   0x1   :  { %v4_v0 = vld [vmem:[%s55_s0] sm:$0xf]  ;;  %s36_s0 = smov 48  }
   0x2   :  { %5 = vst [vmem:[#allocation1] sm:$0xf] %v4_v0 }
   0x9   :  { %v10_v1 = vld [vmem:[#allocation1 + $0x3] sm:$0x1]   ;;  %v22_v2 = vld [vmem:[#allocation1 + $0x1] sm:$0x1]   ;;  %v6_v3 = vld [vmem:[#allocation1] sm:$0x1]  }
   0xa   :  { %11 = vrot.lane.b32.xlu0 %v10_v1, %s36_s0  ;;  %23 = vrot.lane.b32.xlu1 %v22_v2, %s37_s8  ;;  %v16_v4 = vld [vmem:[#allocation1 + $0x2] sm:$0x1]   ;;  %8 = vst.msk [vmem:[#allocation0] sm:$0x1] %vm7_vm0, %v6_v3  }
   0xe   :  { %17 = vrot.lane.b32.xlu0 %v16_v4, %s38_s9 }
  0x7c   :  { %v12_v5 = vpop.permute.xlu0 %11   ;;  %v24_v6 = vpop.permute.xlu1 %23  }
  0x7d   :  { %14 = vst.msk [vmem:[#allocation0] sm:$0x1] %vm13_vm1, %v12_v5  }
  0x80   :  { %v18_v7 = vpop.permute.xlu0 %17  }
  0x81   :  { %20 = vst.msk [vmem:[#allocation0] sm:$0x1] %vm19_vm2, %v18_v7  }
  0x82   :  { %26 = vst.msk [vmem:[#allocation0] sm:$0x1] %vm25_vm3, %v24_v6  }
  0x89   :  { %v30_v8 = vld [vmem:[#allocation0] sm:$0x1] }
  0x8a   :  { %32 = vst [vmem:[%s56_s1] sm:$0x1] %v30_v8 }

// kernel: a_call__.1
= control target key start
LH: loop header
LB: loop body
LE: loop exit
PB: predicated region body
PF: predicated region fallthrough
CT: control target
= control target key end

     0   :  { %17 = vsyncpa [#allocation6], 0  ;;  %s2790_s21 = smov 0   ;;  %s3719_s0 = inlined_call_operand.vmem [shape: f32[4], index: 0, kind: input, shape index: {}]   ;;  %s3720_s1 = inlined_call_operand.vmem [shape: f32[2,4,256], index: 1, kind: input, shape index: {}]   ;;  %s3721_s2 = inlined_call_operand.vmem [shape: f32[2,4,64], index: 2, kind: input, shape index: {}]   ;;  %s3722_s3 = inlined_call_operand.vmem [shape: f32[2,4,128], index: 3, kind: input, shape index: {}]   ;;  %s3723_s4 = inlined_call_operand.vmem [shape: f32[3,256,128], index: 4, kind: input, shape index: {}]   ;;  %s3724_s5 = inlined_call_operand.vmem [shape: f32[1,128], index: 5, kind: input, shape index: {}]   ;;  %s3725_s6 = inlined_call_operand.vmem [shape: f32[3,128,64], index: 6, kind: input, shape index: {}]   ;;  %s3726_s7 = inlined_call_operand.vmem [shape: f32[1,64], index: 7, kind: input, shape index: {}]   ;;  %s3727_s8 = inlined_call_operand.vmem [shape: f32[3,64,128], index: 8, kind: input, shape index: {}]   ;;  %s3728_s9 = inlined_call_operand.vmem [shape: f32[1,128], index: 9, kind: input, shape index: {}]   ;;  %s3729_s10 = inlined_call_operand.vmem [shape: f32[3,128,256], index: 10, kind: input, shape index: {}]   ;;  %s3730_s11 = inlined_call_operand.vmem [shape: f32[1,256], index: 11, kind: input, shape index: {}]   ;;  %s3731_s12 = inlined_call_operand.vmem [shape: f32[2,4,256], index: 12, kind: output, shape index: {}]  }
   0x1 LB: > { %s2796_s22 = sadd.s32 4294967295, %s2719_s21   ;;  %p1821_p0 = scmp.ge.s32.totalorder %s2719_s21, 1  ;;  %s2719_s21 = sphi %s2790_s21, %s23_s21  }
   0x2   : > { %p321_p1 = scmp.lt.s32.totalorder %s2719_s21, 3  ;;  %s334_s25 = sshll.u32 %s3719_s0, 4  ;;  %s335_s25 = int_to_ptr.vmem [resolvable:$true] %s334_s25 }
   0x3   : > { %p2678_p3 = scmp.eq.s32.totalorder %s2796_s22, 0  ;;  %s2694_s27 = scalar_lea.vmem %s335_s25, 16 }
   0x4   : > { %p2803_p2 = pnand %p1821_p0, %p321_p1  ;;  %p2695_p6 = scmp.ne.s32.totalorder %s335_s25, %s2694_s27 }
   0x5   : > { %p2702_p10 = scmp.lt.s32.totalorder %s335_s25, %s335_s25  ;;  %p2703_p11 = scmp.lt.s32.totalorder %s2694_s27, %s2694_s27 }
   0x6   : > { %p2674_p4 = pneg %p2803_p2 }
   0x7   : > { %p2704_p12 = por %p2703_p11, %p2702_p10 }
   0x8   : > { %p2675_p5 = pnand %p2678_p3, %p2674_p4 }
   0xa   : > { %p2696_p7 = pneg %p2675_p5 }
   0xc   : > { %p2697_p8 = pnand %p2696_p7, %p2695_p6 }
   0xe   : > { %p2698_p9 = pneg %p2697_p8 }
  0x10   : > { %p2705_p13 = pnand %p2704_p12, %p2698_p9 }
  0x12   : > { %2708 = shalt.err (!%p2705_p13)
}
  0x13   : > { %s2721_s28 = smov [#allocation5]   ;;  %393 = sbr.rel (%p2803_p2) target bundleno = 1169 (0x491), region = 68 }
  0x14   : > { %2677 = dma.vmem_to_smem (!%p2675_p5), %s335_s25, 16, %s2721_s28, [#allocation6]  }
  0x1a   : > { %2714 = dma.done.wait (%p2678_p3), [#allocation6], 16  }
  0x1b   : > { %2716 = vsyncadd (%p2678_p3), [#allocation6], 4294967280 }
  0x1c   : > { %399 = sfence }
  0x1d   : > { %v1848_v0 = vld [vmem:[%s3723_s4 + $0x180] sm:$0xff]  ;;  %v1849_v1 = vld [vmem:[%s3723_s4 + $0x188] sm:$0xff]  ;;  %p444_p0 = scmp.lt.s32.totalorder %s2796_s22, 1  ;;  %v462_v3 = vlaneseq  ;;  %v1850_v6 = vld [vmem:[%s3723_s4 + $0x190] sm:$0xff]  ;;  %v2722_v8 = vmov 0.0   ;;  %vm2724_vm1 = vmmov 0  }
  0x1e   : > { %v1832_v2 = vld [vmem:[%s3723_s4 + $0x100] sm:$0xff]  ;;  %v2366_v4 = vpack.c.bf16 %v1849_v1, %v1848_v0  ;;  %v1833_v5 = vld [vmem:[%s3723_s4 + $0x108] sm:$0xff]  ;;  %v1851_v7 = vld [vmem:[%s3723_s4 + $0x198] sm:$0xff]  ;;  %471 = vst [vmem:[#allocation3] sm:$0x1] %v2722_v8  ;;  %2236 = vmatprep.mubr.msk.f32.mxu1 %vm2724_vm1, %v2722_v8  ;;  %s820_s16 = sld [smem:[#allocation5]] }
  0x1f   : > { %472 = vst [vmem:[#allocation3 + $0x5] sm:$0x1] %v2722_v8  ;;  %v2368_v9 = vpack.c.bf16 %v1833_v5, %v1832_v2  ;;  %v2370_v10 = vpack.c.bf16 %v1851_v7, %v1850_v6  ;;  %v1834_v11 = vld [vmem:[%s3723_s4 + $0x110] sm:$0xff]  ;;  %v1835_v12 = vld [vmem:[%s3723_s4 + $0x118] sm:$0xff]  ;;  %v1852_v13 = vld [vmem:[%s3723_s4 + $0x1a0] sm:$0xff]  ;;  %s3734_s22 = smov (!%p444_p0, %s2796_s22), 1 }
  0x20   : > { %vm464_vm0 = vcmp.lt.s32.totalorder %v462_v3, 256  ;;  %2367 = vmatprep.subr.bf16.mxu0 %v2366_v4  ;;  %v1853_v14 = vld [vmem:[%s3723_s4 + $0x1a8] sm:$0xff]  ;;  %v2372_v15 = vpack.c.bf16 %v1835_v12, %v1834_v11  ;;  %s2019_s15 = sshll.u32 %s3734_s22, 3  ;;  %v1836_v17 = vld [vmem:[%s3723_s4 + $0x120] sm:$0xff]  ;;  %v1854_v19 = vld [vmem:[%s3723_s4 + $0x1b0] sm:$0xff]  ;;  %vm473_vm3 = vcmask 516096  }
  0x21   : > { %466 = vst.msk [vmem:[#allocation2] ss:$8 sm:$0x3] %vm464_vm0, %v2722_v8  ;;  %469 = vst.msk [vmem:[#allocation2 + $0x5] ss:$8 sm:$0x3] %vm464_vm0, %v2722_v8  ;;  %2369 = vmatpush3.bf16.msra.mxu0 %v2368_v9  ;;  %v2374_v16 = vpack.c.bf16 %v1853_v14, %v1852_v13  ;;  %s2877_s28 = scalar_lea.vmem %s3720_s1, %s2019_s15  ;;  %s461_s24 = scalar_lea.vmem %s3731_s12, %s2019_s15 }
  0x22   : > { %2371 = vmatprep.subr.bf16.mxu0 %v2370_v10  ;;  %v1837_v18 = vld [vmem:[%s3723_s4 + $0x128] sm:$0xff]  ;;  %v1855_v20 = vld [vmem:[%s3723_s4 + $0x1b8] sm:$0xff]  ;;  %v1838_v23 = vld [vmem:[%s3723_s4 + $0x130] sm:$0xff]  ;;  %474 = vst.msk [vmem:[#allocation4] sm:$0x1] %vm473_vm3, %v2722_v8  ;;  %s1930_s30 = sld [smem:[#allocation5 + $0x1]] }
  0x23   : > { %v2376_v21 = vpack.c.bf16 %v1837_v18, %v1836_v17  ;;  %v2378_v22 = vpack.c.bf16 %v1855_v20, %v1854_v19  ;;  %v1839_v24 = vld [vmem:[%s3723_s4 + $0x138] sm:$0xff]  ;;  %v1856_v25 = vld [vmem:[%s3723_s4 + $0x1c0] sm:$0xff]  ;;  %v1857_v26 = vld [vmem:[%s3723_s4 + $0x1c8] sm:$0xff]  ;;  %475 = vst.msk [vmem:[#allocation4 + $0x5] sm:$0x1] %vm473_vm3, %v2722_v8  ;;  %vm1103_vm5 = vcmask 519168  }
  0x24   : > { %v476_v27 = vld [vmem:[%s2877_s28] sm:$0xff]  ;;  %v2380_v30 = vpack.c.bf16 %v1839_v24, %v1838_v23  ;;  %v2382_v31 = vpack.c.bf16 %v1857_v26, %v1856_v25  ;;  %v1841_v33 = vld [vmem:[%s3723_s4 + $0x148] sm:$0xff]  ;;  %v1858_v35 = vld [vmem:[%s3723_s4 + $0x1d0] sm:$0xff]  ;;  %vm1129_vm6 = vcmask 523264   ;;  %s1951_s29 = sld [smem:[#allocation5 + $0x2]]  ;;  %s2016_s17 = sld [smem:[#allocation5 + $0x3]] }
  0x25   : > { %2373 = vmatpush3.bf16.msra.mxu0 %v2372_v15  ;;  %v478_v28 = vcombine.high %v476_v27, %v476_v27  ;;  %v479_v29 = vrot.slane %v476_v27, 7  ;;  %v1840_v32 = vld [vmem:[%s3723_s4 + $0x140] sm:$0xff]  ;;  %v1859_v36 = vld [vmem:[%s3723_s4 + $0x1d8] sm:$0xff]  ;;  %v1842_v39 = vld [vmem:[%s3723_s4 + $0x150] sm:$0xff] }
  0x26   : > { %2375 = vmatprep.subr.bf16.mxu0 %v2374_v16  ;;  %v2384_v37 = vpack.c.bf16 %v1841_v33, %v1840_v32  ;;  %v2386_v38 = vpack.c.bf16 %v1859_v36, %v1858_v35  ;;  %v1843_v40 = vld [vmem:[%s3723_s4 + $0x158] sm:$0xff]  ;;  %v1860_v41 = vld [vmem:[%s3723_s4 + $0x1e0] sm:$0xff]  ;;  %v1861_v42 = vld [vmem:[%s3723_s4 + $0x1e8] sm:$0xff] }
  0x27   : > { %v480_v34 = vrot.slane %v478_v28, 7  ;;  %483 = vst [vmem:[#allocation2] sm:$0x1e] %v479_v29  ;;  %v2388_v43 = vpack.c.bf16 %v1843_v40, %v1842_v39  ;;  %v2390_v44 = vpack.c.bf16 %v1861_v42, %v1860_v41  ;;  %v1844_v45 = vld [vmem:[%s3723_s4 + $0x160] sm:$0xff]  ;;  %v1845_v46 = vld [vmem:[%s3723_s4 + $0x168] sm:$0xff]  ;;  %v1862_v47 = vld [vmem:[%s3723_s4 + $0x1f0] sm:$0xff] }
  0x28   : > { %v1863_v48 = vld [vmem:[%s3723_s4 + $0x1f8] sm:$0xff]  ;;  %v2392_v51 = vpack.c.bf16 %v1845_v46, %v1844_v45  ;;  %v1846_v53 = vld [vmem:[%s3723_s4 + $0x170] sm:$0xff]  ;;  %v507_v55 = vld [vmem:[%s3723_s4 + $0x80] sm:$0xff] }
  0x29   : > { %2377 = vmatpush3.bf16.msra.mxu0 %v2376_v21  ;;  %484 = vst [vmem:[#allocation2 + $0x8] sm:$0x1e] %v480_v34  ;;  %v2394_v52 = vpack.c.bf16 %v1863_v48, %v1862_v47  ;;  %v1847_v54 = vld [vmem:[%s3723_s4 + $0x178] sm:$0xff]  ;;  %v508_v56 = vld [vmem:[%s3723_s4 + $0x88] sm:$0xff]  ;;  %v491_v60 = vld [vmem:[%s3723_s4] sm:$0xff] }
  0x2a   : > { %2379 = vmatprep.subr.bf16.mxu0 %v2378_v22  ;;  %v2396_v57 = vpack.c.bf16 %v1847_v54, %v1846_v53  ;;  %v2398_v59 = vpack.c.bf16 %v508_v56, %v507_v55  ;;  %v492_v61 = vld [vmem:[%s3723_s4 + $0x8] sm:$0xff]  ;;  %v509_v62 = vld [vmem:[%s3723_s4 + $0x90] sm:$0xff]  ;;  %v510_v63 = vld [vmem:[%s3723_s4 + $0x98] sm:$0xff] }
  0x2b   : > { %v2400_v1 = vpack.c.bf16 %v492_v61, %v491_v60  ;;  %v2402_v2 = vpack.c.bf16 %v510_v63, %v509_v62  ;;  %v493_v4 = vld [vmem:[%s3723_s4 + $0x10] sm:$0xff]  ;;  %v494_v5 = vld [vmem:[%s3723_s4 + $0x18] sm:$0xff]  ;;  %v511_v7 = vld [vmem:[%s3723_s4 + $0xa0] sm:$0xff] }
  0x2c   : > { %v512_v9 = vld [vmem:[%s3723_s4 + $0xa8] sm:$0xff]  ;;  %v2404_v10 = vpack.c.bf16 %v494_v5, %v493_v4  ;;  %v495_v12 = vld [vmem:[%s3723_s4 + $0x20] sm:$0xff]  ;;  %v513_v14 = vld [vmem:[%s3723_s4 + $0xb0] sm:$0xff] }
  0x2d   : > { %2381 = vmatpush3.bf16.msra.mxu0 %v2380_v30  ;;  %v2406_v11 = vpack.c.bf16 %v512_v9, %v511_v7  ;;  %v496_v13 = vld [vmem:[%s3723_s4 + $0x28] sm:$0xff]  ;;  %v514_v15 = vld [vmem:[%s3723_s4 + $0xb8] sm:$0xff]  ;;  %v497_v18 = vld [vmem:[%s3723_s4 + $0x30] sm:$0xff] }
  0x2e   : > { %2383 = vmatprep.subr.bf16.mxu0 %v2382_v31  ;;  %v487_v58 = vld [vmem:[#allocation2] sm:$0x1e]  ;;  %v2408_v16 = vpack.c.bf16 %v496_v13, %v495_v12  ;;  %v2410_v17 = vpack.c.bf16 %v514_v15, %v513_v14  ;;  %v498_v19 = vld [vmem:[%s3723_s4 + $0x38] sm:$0xff]  ;;  %v516_v21 = vld [vmem:[%s3723_s4 + $0xc8] sm:$0xff] }
  0x2f   : > { %v558_v0 = vrot.slane %v487_v58, 1  ;;  %v515_v20 = vld [vmem:[%s3723_s4 + $0xc0] sm:$0xff]  ;;  %v2412_v22 = vpack.c.bf16 %v498_v19, %v497_v18  ;;  %v500_v25 = vld [vmem:[%s3723_s4 + $0x48] sm:$0xff]  ;;  %v517_v26 = vld [vmem:[%s3723_s4 + $0xd0] sm:$0xff] }
  0x30   : > { %v488_v49 = vld [vmem:[#allocation2 + $0x8] sm:$0x1e]  ;;  %v2414_v23 = vpack.c.bf16 %v516_v21, %v515_v20  ;;  %v499_v24 = vld [vmem:[%s3723_s4 + $0x40] sm:$0xff]  ;;  %v518_v27 = vld [vmem:[%s3723_s4 + $0xd8] sm:$0xff] }
  0x31   : > { %2385 = vmatpush3.bf16.msra.mxu0 %v2384_v37  ;;  %v559_v50 = vrot.slane %v488_v49, 1  ;;  %v486_v6 = vld [vmem:[#allocation2 + $0x8] sm:$0xf]  ;;  %v2416_v28 = vpack.c.bf16 %v500_v25, %v499_v24  ;;  %v2418_v29 = vpack.c.bf16 %v518_v27, %v517_v26  ;;  %v501_v30 = vld [vmem:[%s3723_s4 + $0x50] sm:$0xff]  ;;  %v502_v31 = vld [vmem:[%s3723_s4 + $0x58] sm:$0xff] }
  0x32   : > { %2387 = vmatprep.subr.bf16.mxu0 %v2386_v38  ;;  %v519_v32 = vld [vmem:[%s3723_s4 + $0xe0] sm:$0xff]  ;;  %v520_v33 = vld [vmem:[%s3723_s4 + $0xe8] sm:$0xff]  ;;  %v2420_v34 = vpack.c.bf16 %v502_v31, %v501_v30  ;;  %v521_v38 = vld [vmem:[%s3723_s4 + $0xf0] sm:$0xff] }
  0x33   : > { %626 = vmatprep.mubr.f32.mxu0 %v559_v50  ;;  %v2422_v35 = vpack.c.bf16 %v520_v33, %v519_v32  ;;  %v503_v36 = vld [vmem:[%s3723_s4 + $0x60] sm:$0xff]  ;;  %v504_v37 = vld [vmem:[%s3723_s4 + $0x68] sm:$0xff]  ;;  %v522_v39 = vld [vmem:[%s3723_s4 + $0xf8] sm:$0xff] }
  0x34   : > { %v2424_v40 = vpack.c.bf16 %v504_v37, %v503_v36  ;;  %v2426_v41 = vpack.c.bf16 %v522_v39, %v521_v38  ;;  %v505_v42 = vld [vmem:[%s3723_s4 + $0x70] sm:$0xff]  ;;  %v1881_v45 = vld [vmem:[%s3723_s4 + $0x288] sm:$0xff]  ;;  %v1864_v48 = vld [vmem:[%s3723_s4 + $0x200] sm:$0xff]  ;;  %v2723_v39 = vmov 0.0|0.0  }
  0x35   : > { %2389 = vmatpush3.bf16.msra.mxu0 %v2388_v43  ;;  %v506_v43 = vld [vmem:[%s3723_s4 + $0x78] sm:$0xff]  ;;  %v1865_v49 = vld [vmem:[%s3723_s4 + $0x208] sm:$0xff]  ;;  %v485_v53 = vld [vmem:[#allocation2] sm:$0xf]  ;;  %2462 = vmatprep.subr.bf16.mxu1 %v2723_v39 }
  0x36   : > { %2391 = vmatprep.subr.bf16.mxu0 %v2390_v44  ;;  %v1880_v44 = vld [vmem:[%s3723_s4 + $0x280] sm:$0xff]  ;;  %v2428_v46 = vpack.c.bf16 %v506_v43, %v505_v42  ;;  %v490_v50 = vld [vmem:[#allocation2 + $0x8] sm:$0x3c]  ;;  %v2432_v54 = vpack.c.bf16 %v1865_v49, %v1864_v48  ;;  %v1867_v58 = vld [vmem:[%s3723_s4 + $0x218] sm:$0xff] }
  0x37   : > { %v2430_v47 = vpack.c.bf16 %v1881_v45, %v1880_v44  ;;  %v738_v55 = vrot.slane %v490_v50, 2  ;;  %v1885_v60 = vld [vmem:[%s3723_s4 + $0x2a8] sm:$0xff]  ;;  %v1868_v63 = vld [vmem:[%s3723_s4 + $0x220] sm:$0xff]  ;;  %v1871_v7 = vld [vmem:[%s3723_s4 + $0x238] sm:$0xff] }
  0x38   : > { %v1888_v9 = vld [vmem:[%s3723_s4 + $0x2c0] sm:$0xff]  ;;  %v1873_v14 = vld [vmem:[%s3723_s4 + $0x248] sm:$0xff]  ;;  %v1890_v15 = vld [vmem:[%s3723_s4 + $0x2d0] sm:$0xff] }
  0x39   : > { %2393 = vmatpush3.bf16.msra.mxu0 %v2392_v51  ;;  %v1882_v51 = vld [vmem:[%s3723_s4 + $0x290] sm:$0xff]  ;;  %v1872_v13 = vld [vmem:[%s3723_s4 + $0x240] sm:$0xff]  ;;  %v1875_v20 = vld [vmem:[%s3723_s4 + $0x258] sm:$0xff] }
  0x3a   : > { %2395 = vmatprep.subr.bf16.mxu0 %v2394_v52  ;;  %v1883_v52 = vld [vmem:[%s3723_s4 + $0x298] sm:$0xff]  ;;  %v1874_v19 = vld [vmem:[%s3723_s4 + $0x250] sm:$0xff]  ;;  %v1892_v21 = vld [vmem:[%s3723_s4 + $0x2e0] sm:$0xff] }
  0x3b   : > { %v2434_v56 = vpack.c.bf16 %v1883_v52, %v1882_v51  ;;  %v1876_v25 = vld [vmem:[%s3723_s4 + $0x260] sm:$0xff]  ;;  %v1877_v26 = vld [vmem:[%s3723_s4 + $0x268] sm:$0xff]  ;;  %v1894_v27 = vld [vmem:[%s3723_s4 + $0x2f0] sm:$0xff] }
  0x3c   : > { %v1878_v31 = vld [vmem:[%s3723_s4 + $0x270] sm:$0xff]  ;;  %v1879_v32 = vld [vmem:[%s3723_s4 + $0x278] sm:$0xff]  ;;  %v1897_v36 = vld [vmem:[%s3725_s6 + $0x80] sm:$0xff] }
  0x3d   : > { %2397 = vmatpush3.bf16.msra.mxu0 %v2396_v57  ;;  %v1866_v57 = vld [vmem:[%s3723_s4 + $0x210] sm:$0xff]  ;;  %v2460_v33 = vpack.c.bf16 %v1879_v32, %v1878_v31  ;;  %v1898_v37 = vld [vmem:[%s3725_s6 + $0x88] sm:$0xff]  ;;  %v829_v38 = vld [vmem:[%s3725_s6] sm:$0xff] }
  0x3e   : > { %2399 = vmatprep.subr.bf16.mxu0 %v2398_v59  ;;  %v1884_v59 = vld [vmem:[%s3723_s4 + $0x2a0] sm:$0xff]  ;;  %v2436_v61 = vpack.c.bf16 %v1867_v58, %v1866_v57  ;;  %v1899_v42 = vld [vmem:[%s3725_s6 + $0x90] sm:$0xff]  ;;  %v1900_v43 = vld [vmem:[%s3725_s6 + $0x98] sm:$0xff] }
  0x3f   : > { %v2438_v62 = vpack.c.bf16 %v1885_v60, %v1884_v59  ;;  %v831_v45 = vld [vmem:[%s3725_s6 + $0x10] sm:$0xff]  ;;  %v1901_v49 = vld [vmem:[%s3725_s6 + $0xa0] sm:$0xff]  ;;  %v1902_v50 = vld [vmem:[%s3725_s6 + $0xa8] sm:$0xff] }
  0x40   : > { %627 = vmatmul.mubr.f32.vlgmr.msra.gmra.mrb[0].mxu0 %v558_v0  ;;  %v1869_v0 = vld [vmem:[%s3723_s4 + $0x228] sm:$0xff]  ;;  %v833_v51 = vld [vmem:[%s3725_s6 + $0x20] sm:$0xff]  ;;  %v835_v58 = vld [vmem:[%s3725_s6 + $0x30] sm:$0xff] }
  0x41   : > { %2401 = vmatpush3.bf16.msra.mxu0 %v2400_v1  ;;  %696 = vmatprep.mubr.f32.mxu0 %v486_v6  ;;  %v1886_v1 = vld [vmem:[%s3723_s4 + $0x2b0] sm:$0xff]  ;;  %v2440_v4 = vpack.c.bf16 %v1869_v0, %v1868_v63  ;;  %v834_v52 = vld [vmem:[%s3725_s6 + $0x28] sm:$0xff]  ;;  %v836_v59 = vld [vmem:[%s3725_s6 + $0x38] sm:$0xff] }
  0x42   : > { %2403 = vmatprep.subr.bf16.mxu0 %v2402_v2  ;;  %v1887_v2 = vld [vmem:[%s3723_s4 + $0x2b8] sm:$0xff]  ;;  %v1870_v6 = vld [vmem:[%s3723_s4 + $0x230] sm:$0xff]  ;;  %v2496_v60 = vpack.c.bf16 %v836_v59, %v835_v58  ;;  %v837_v0 = vld [vmem:[%s3725_s6 + $0x40] sm:$0xff] }
  0x43   : > { %v2442_v5 = vpack.c.bf16 %v1887_v2, %v1886_v1  ;;  %v838_v1 = vld [vmem:[%s3725_s6 + $0x48] sm:$0xff]  ;;  %v1924_v58 = vld [vmem:[%s3725_s6 + $0x158] sm:$0xff] }
  0x44   : > { %v2499_v2 = vpack.c.bf16 %v838_v1, %v837_v0  ;;  %v1928_v0 = vld [vmem:[%s3725_s6 + $0x178] sm:$0xff] }
  0x45   : > { %2405 = vmatpush3.bf16.msra.mxu0 %v2404_v10  ;;  %v1889_v10 = vld [vmem:[%s3723_s4 + $0x2c8] sm:$0xff] }
  0x46   : > { %2407 = vmatprep.subr.bf16.mxu0 %v2406_v11  ;;  %v2444_v11 = vpack.c.bf16 %v1871_v7, %v1870_v6  ;;  %v2446_v12 = vpack.c.bf16 %v1889_v10, %v1888_v9  ;;  %v839_v7 = vld [vmem:[%s3725_s6 + $0x50] sm:$0xff]  ;;  %v840_v9 = vld [vmem:[%s3725_s6 + $0x58] sm:$0xff] }
  0x47   : > { %v2502_v10 = vpack.c.bf16 %v840_v9, %v839_v7  ;;  %v1112_v7 = vld [vmem:[%s3727_s8] sm:$0xff]  ;;  %v1113_v9 = vld [vmem:[%s3727_s8 + $0x8] sm:$0xff] }
  0x49   : > { %2409 = vmatpush3.bf16.msra.mxu0 %v2408_v16  ;;  %v1891_v16 = vld [vmem:[%s3723_s4 + $0x2d8] sm:$0xff] }
  0x4a   : > { %2411 = vmatprep.subr.bf16.mxu0 %v2410_v17  ;;  %v2448_v17 = vpack.c.bf16 %v1873_v14, %v1872_v13  ;;  %v2450_v18 = vpack.c.bf16 %v1891_v16, %v1890_v15  ;;  %v841_v14 = vld [vmem:[%s3725_s6 + $0x60] sm:$0xff]  ;;  %v842_v15 = vld [vmem:[%s3725_s6 + $0x68] sm:$0xff] }
  0x4b   : > { %v2505_v16 = vpack.c.bf16 %v842_v15, %v841_v14  ;;  %v1114_v14 = vld [vmem:[%s3727_s8 + $0x10] sm:$0xff]  ;;  %v1115_v15 = vld [vmem:[%s3727_s8 + $0x18] sm:$0xff] }
  0x4d   : > { %2413 = vmatpush3.bf16.msra.mxu0 %v2412_v22  ;;  %v1893_v22 = vld [vmem:[%s3723_s4 + $0x2e8] sm:$0xff] }
  0x4e   : > { %2415 = vmatprep.subr.bf16.mxu0 %v2414_v23  ;;  %v2452_v23 = vpack.c.bf16 %v1875_v20, %v1874_v19  ;;  %v2454_v24 = vpack.c.bf16 %v1893_v22, %v1892_v21  ;;  %v843_v19 = vld [vmem:[%s3725_s6 + $0x70] sm:$0xff]  ;;  %v844_v21 = vld [vmem:[%s3725_s6 + $0x78] sm:$0xff] }
  0x4f   : > { %v2508_v22 = vpack.c.bf16 %v844_v21, %v843_v19  ;;  %v1117_v21 = vld [vmem:[%s3727_s8 + $0x28] sm:$0xff] }
  0x51   : > { %2417 = vmatpush3.bf16.msra.mxu0 %v2416_v28  ;;  %v1895_v28 = vld [vmem:[%s3723_s4 + $0x2f8] sm:$0xff] }
  0x52   : > { %2419 = vmatprep.subr.bf16.mxu0 %v2418_v29  ;;  %v2456_v29 = vpack.c.bf16 %v1877_v26, %v1876_v25  ;;  %v2458_v30 = vpack.c.bf16 %v1895_v28, %v1894_v27 }
  0x55   : > { %2421 = vmatpush3.bf16.msra.mxu0 %v2420_v34  ;;  %v489_v34 = vld [vmem:[#allocation2] sm:$0x3c] }
  0x56   : > { %2423 = vmatprep.subr.bf16.mxu0 %v2422_v35  ;;  %v737_v35 = vrot.slane %v489_v34, 2 }
  0x59   : > { %2425 = vmatpush3.bf16.msra.mxu0 %v2424_v40  ;;  %v2463_v40 = vpack.c.bf16 %v1898_v37, %v1897_v36 }
  0x5a   : > { %2427 = vmatprep.subr.bf16.mxu0 %v2426_v41  ;;  %v830_v41 = vld [vmem:[%s3725_s6 + $0x8] sm:$0xff] }
  0x5b   : > { %v2487_v44 = vpack.c.bf16 %v830_v41, %v829_v38  ;;  %2464 = vmatpush3.bf16.msra.mxu1 %v2463_v40  ;;  %v1913_v40 = vld [vmem:[%s3725_s6 + $0x100] sm:$0xff]  ;;  %v1914_v41 = vld [vmem:[%s3725_s6 + $0x108] sm:$0xff] }
  0x5c   : > { %2465 = vmatprep.subr.bf16.mxu1 %v2723_v39 }
  0x5d   : > { %2429 = vmatpush3.bf16.msra.mxu0 %v2428_v46  ;;  %v832_v46 = vld [vmem:[%s3725_s6 + $0x18] sm:$0xff] }
  0x5e   : > { %2431 = vmatprep.subr.bf16.mxu0 %v2430_v47  ;;  %v2466_v47 = vpack.c.bf16 %v1900_v43, %v1899_v42  ;;  %v2490_v48 = vpack.c.bf16 %v832_v46, %v831_v45  ;;  %v2511_v42 = vpack.c.bf16 %v1914_v41, %v1913_v40  ;;  %v1915_v43 = vld [vmem:[%s3725_s6 + $0x110] sm:$0xff] }
  0x60   : > { %697 = vmatmul.mubr.f32.vlgmr.msra.gmra.mrb[2].mxu0 %v485_v53  ;;  %2467 = vmatpush3.bf16.msra.mxu1 %v2466_v47  ;;  %v2469_v53 = vpack.c.bf16 %v1902_v50, %v1901_v49  ;;  %v1918_v49 = vld [vmem:[%s3725_s6 + $0x128] sm:$0xff] }
  0x61   : > { %2433 = vmatpush3.bf16.msra.mxu0 %v2432_v54  ;;  %805 = vmatprep.mubr.f32.mxu0 %v738_v55  ;;  %v2493_v54 = vpack.c.bf16 %v834_v52, %v833_v51  ;;  %v1903_v55 = vld [vmem:[%s3725_s6 + $0xb0] sm:$0xff]  ;;  %v1920_v52 = vld [vmem:[%s3725_s6 + $0x138] sm:$0xff] }
  0x62   : > { %2435 = vmatprep.subr.bf16.mxu0 %v2434_v56  ;;  %2468 = vmatprep.subr.bf16.mxu1 %v2723_v39  ;;  %v1904_v56 = vld [vmem:[%s3725_s6 + $0xb8] sm:$0xff]  ;;  %v1919_v51 = vld [vmem:[%s3725_s6 + $0x130] sm:$0xff] }
  0x63   : > { %v2472_v57 = vpack.c.bf16 %v1904_v56, %v1903_v55  ;;  %v1922_v55 = vld [vmem:[%s3725_s6 + $0x148] sm:$0xff] }
  0x64   : > { %2470 = vmatpush3.bf16.msra.mxu1 %v2469_v53  ;;  %v2520_v53 = vpack.c.bf16 %v1920_v52, %v1919_v51 }
  0x65   : > { %2437 = vmatpush3.bf16.msra.mxu0 %v2436_v61  ;;  %2471 = vmatprep.subr.bf16.mxu1 %v2723_v39  ;;  %v1905_v61 = vld [vmem:[%s3725_s6 + $0xc0] sm:$0xff] }
  0x66   : > { %2439 = vmatprep.subr.bf16.mxu0 %v2438_v62  ;;  %v1906_v62 = vld [vmem:[%s3725_s6 + $0xc8] sm:$0xff] }
  0x67   : > { %v2475_v63 = vpack.c.bf16 %v1906_v62, %v1905_v61  ;;  %v1926_v61 = vld [vmem:[%s3725_s6 + $0x168] sm:$0xff] }
  0x68   : > { %2473 = vmatpush3.bf16.msra.mxu1 %v2472_v57  ;;  %v1923_v57 = vld [vmem:[%s3725_s6 + $0x150] sm:$0xff] }
  0x69   : > { %2441 = vmatpush3.bf16.msra.mxu0 %v2440_v4  ;;  %2474 = vmatprep.subr.bf16.mxu1 %v2723_v39  ;;  %v1907_v4 = vld [vmem:[%s3725_s6 + $0xd0] sm:$0xff]  ;;  %v2526_v59 = vpack.c.bf16 %v1924_v58, %v1923_v57  ;;  %v1948_v58 = vld [vmem:[%s3727_s8 + $0xb8] sm:$0xff] }
  0x6a   : > { %2443 = vmatprep.subr.bf16.mxu0 %v2442_v5  ;;  %v1908_v5 = vld [vmem:[%s3725_s6 + $0xd8] sm:$0xff]  ;;  %v1947_v57 = vld [vmem:[%s3727_s8 + $0xb0] sm:$0xff] }
  0x6b   : > { %v2478_v6 = vpack.c.bf16 %v1908_v5, %v1907_v4  ;;  %v1931_v4 = vld [vmem:[%s3727_s8 + $0x40] sm:$0xff]  ;;  %v1932_v5 = vld [vmem:[%s3727_s8 + $0x48] sm:$0xff] }
  0x6c   : > { %2476 = vmatpush3.bf16.msra.mxu1 %v2475_v63  ;;  %v1927_v63 = vld [vmem:[%s3725_s6 + $0x170] sm:$0xff] }
  0x6d   : > { %2445 = vmatpush3.bf16.msra.mxu0 %v2444_v11  ;;  %2477 = vmatprep.subr.bf16.mxu1 %v2723_v39  ;;  %v1909_v11 = vld [vmem:[%s3725_s6 + $0xe0] sm:$0xff]  ;;  %v2532_v1 = vpack.c.bf16 %v1928_v0, %v1927_v63 }
  0x6e   : > { %2447 = vmatprep.subr.bf16.mxu0 %v2446_v12  ;;  %v1910_v12 = vld [vmem:[%s3725_s6 + $0xe8] sm:$0xff]  ;;  %v1952_v63 = vld [vmem:[%s3729_s10 + $0x100] sm:$0xff] }
  0x6f   : > { %v2481_v13 = vpack.c.bf16 %v1910_v12, %v1909_v11  ;;  %v1933_v11 = vld [vmem:[%s3727_s8 + $0x50] sm:$0xff]  ;;  %v1934_v12 = vld [vmem:[%s3727_s8 + $0x58] sm:$0xff] }
  0x70   : > { %2479 = vmatpush3.bf16.msra.mxu1 %v2478_v6  ;;  %v2535_v6 = vpack.c.bf16 %v1932_v5, %v1931_v4 }
  0x71   : > { %2449 = vmatpush3.bf16.msra.mxu0 %v2448_v17  ;;  %2480 = vmatprep.subr.bf16.mxu1 %v2723_v39  ;;  %v1911_v17 = vld [vmem:[%s3725_s6 + $0xf0] sm:$0xff] }
  0x72   : > { %2451 = vmatprep.subr.bf16.mxu0 %v2450_v18  ;;  %v1912_v18 = vld [vmem:[%s3725_s6 + $0xf8] sm:$0xff] }
  0x73   : > { %v2484_v20 = vpack.c.bf16 %v1912_v18, %v1911_v17  ;;  %v1935_v17 = vld [vmem:[%s3727_s8 + $0x60] sm:$0xff]  ;;  %v1936_v18 = vld [vmem:[%s3727_s8 + $0x68] sm:$0xff] }
  0x74   : > { %2482 = vmatpush3.bf16.msra.mxu1 %v2481_v13  ;;  %v2538_v13 = vpack.c.bf16 %v1934_v12, %v1933_v11  ;;  %v2541_v19 = vpack.c.bf16 %v1936_v18, %v1935_v17  ;;  %v1963_v11 = vld [vmem:[%s3729_s10 + $0x158] sm:$0xff] }
  0x75   : > { %2453 = vmatpush3.bf16.msra.mxu0 %v2452_v23  ;;  %2483 = vmatprep.subr.bf16.mxu1 %v2723_v39  ;;  %v1967_v17 = vld [vmem:[%s3729_s10 + $0x178] sm:$0xff] }
  0x76   : > { %2455 = vmatprep.subr.bf16.mxu0 %v2454_v24 }
  0x78   : > { %2485 = vmatpush3.bf16.msra.mxu1 %v2484_v20  ;;  %v1116_v20 = vld [vmem:[%s3727_s8 + $0x20] sm:$0xff] }
  0x79   : > { %2457 = vmatpush3.bf16.msra.mxu0 %v2456_v29  ;;  %2510 = vmatprep.subr.bf16.mxu1 %v2723_v39 }
  0x7a   : > { %2459 = vmatprep.subr.bf16.mxu0 %v2458_v30 }
  0x7d   : > { %2461 = vmatpush3.bf16.msra.mxu0 %v2460_v33  ;;  %v1896_v33 = vld [vmem:[%s3724_s5] ss:$0 sm:$0xff] }
  0x7e   : > { %2486 = vmatprep.subr.bf16.mxu0 %v2723_v39 }
  0x80   : > { %806 = vmatmul.mubr.f32.vlgmr.msra.gmra.mrb[4].mxu0 %v737_v35  ;;  %v822_v35 = vstv %s820_s16  ;;  %s1828_s16 = sshll.u32 %s3734_s22, 2 }
  0x81   : > { %2488 = vmatpush3.bf16.msra.mxu0 %v2487_v44  ;;  %2271 = vmatprep.mubr.msk.f32.mxu0 %vm2724_vm1, %v2722_v8  ;;  %v1916_v44 = vld [vmem:[%s3725_s6 + $0x118] sm:$0xff]  ;;  %s452_s19 = scalar_lea.vmem %s3721_s2, %s1828_s16  ;;  %s456_s18 = scalar_lea.vmem %s3722_s3, %s1828_s16 }
  0x82   : > { %2489 = vmatprep.subr.bf16.mxu0 %v2723_v39  ;;  %v2514_v47 = vpack.c.bf16 %v1916_v44, %v1915_v43  ;;  %v1106_v43 = vld [vmem:[%s452_s19] sm:$0xf] }
  0x85   : > { %2491 = vmatpush3.bf16.msra.mxu0 %v2490_v48  ;;  %v1917_v48 = vld [vmem:[%s3725_s6 + $0x120] sm:$0xff] }
  0x86   : > { %2492 = vmatprep.subr.bf16.mxu0 %v2723_v39  ;;  %v2517_v50 = vpack.c.bf16 %v1918_v49, %v1917_v48  ;;  %v1943_v49 = vld [vmem:[%s3727_s8 + $0x90] sm:$0xff] }
  0x89   : > { %2494 = vmatpush3.bf16.msra.mxu0 %v2493_v54  ;;  %v1921_v54 = vld [vmem:[%s3725_s6 + $0x140] sm:$0xff] }
  0x8a   : > { %2495 = vmatprep.subr.bf16.mxu0 %v2723_v39  ;;  %v2523_v56 = vpack.c.bf16 %v1922_v55, %v1921_v54  ;;  %v1945_v54 = vld [vmem:[%s3727_s8 + $0xa0] sm:$0xff]  ;;  %v1946_v55 = vld [vmem:[%s3727_s8 + $0xa8] sm:$0xff] }
  0x8d   : > { %2497 = vmatpush3.bf16.msra.mxu0 %v2496_v60  ;;  %v1925_v60 = vld [vmem:[%s3725_s6 + $0x160] sm:$0xff] }
  0x8e   : > { %2498 = vmatprep.subr.bf16.mxu0 %v2723_v39  ;;  %v2529_v62 = vpack.c.bf16 %v1926_v61, %v1925_v60  ;;  %v1953_v61 = vld [vmem:[%s3729_s10 + $0x108] sm:$0xff] }
  0x91   : > { %2500 = vmatpush3.bf16.msra.mxu0 %v2499_v2 }
  0x92   : > { %2501 = vmatprep.subr.bf16.mxu0 %v2723_v39 }
  0x95   : > { %2503 = vmatpush3.bf16.msra.mxu0 %v2502_v10  ;;  %v2547_v10 = vpack.c.bf16 %v1113_v9, %v1112_v7  ;;  %v1958_v7 = vld [vmem:[%s3729_s10 + $0x130] sm:$0xff] }
  0x96   : > { %2504 = vmatprep.subr.bf16.mxu0 %v2723_v39 }
  0x99   : > { %2506 = vmatpush3.bf16.msra.mxu0 %v2505_v16  ;;  %v2550_v16 = vpack.c.bf16 %v1115_v15, %v1114_v14  ;;  %v1962_v14 = vld [vmem:[%s3729_s10 + $0x150] sm:$0xff] }
  0x9a   : > { %2507 = vmatprep.subr.bf16.mxu0 %v2723_v39 }
  0x9d   : > { %2509 = vmatpush3.bf16.msra.mxu0 %v2508_v22  ;;  %v2553_v22 = vpack.c.bf16 %v1117_v21, %v1116_v20  ;;  %v1966_v20 = vld [vmem:[%s3729_s10 + $0x170] sm:$0xff] }
  0x9e   : > { %2534 = vmatprep.subr.bf16.mxu0 %v2723_v39 }
 0x113   : > { %v2053_v23 = vpop.f32.mrb[0].mxu0 }
 0x114   : > { %v2054_v24 = vpop.f32.mrb[1].mxu0 }
 0x115   : > { %v2055_v25 = vadd.f32 %v2054_v24, %v2053_v23  ;;  %v1937_v23 = vld [vmem:[%s3727_s8 + $0x70] sm:$0xff]  ;;  %v1938_v24 = vld [vmem:[%s3727_s8 + $0x78] sm:$0xff] }
 0x133   : > { %v2088_v26 = vpop.f32.mrb[2].mxu0 }
 0x134   : > { %v2089_v27 = vpop.f32.mrb[3].mxu0 }
 0x135   : > { %v2090_v28 = vadd.f32 %v2089_v27, %v2088_v26  ;;  %v1118_v26 = vld [vmem:[%s3727_s8 + $0x30] sm:$0xff]  ;;  %v1119_v27 = vld [vmem:[%s3727_s8 + $0x38] sm:$0xff] }
 0x137   : > { %v699_v29 = vadd.f32 %v2090_v28, %v2055_v25  ;;  %v2544_v25 = vpack.c.bf16 %v1938_v24, %v1937_v23  ;;  %v2556_v28 = vpack.c.bf16 %v1119_v27, %v1118_v26  ;;  %v1971_v23 = vld [vmem:[%s3729_s10 + $0x198] sm:$0xff]  ;;  %v1970_v26 = vld [vmem:[%s3729_s10 + $0x190] sm:$0xff] }
 0x153   : > { %v2123_v30 = vpop.f32.mrb[4].mxu0 }
 0x154   : > { %v2124_v31 = vpop.f32.mrb[5].mxu0 }
 0x155   : > { %v2125_v32 = vadd.f32 %v2124_v31, %v2123_v30 }
 0x157   : > { %v811_v34 = vadd.f32 %v2125_v32, %v699_v29 }
 0x159   : > { %v819_v36 = vadd.f32 %v1896_v33, %v811_v34 }
 0x15b   : > { %vm821_vm2 = vcmp.ge.f32.partialorder %v819_v36, 0.0  ;;  %v823_v37 = vmul.f32 %v822_v35, %v819_v36  ;;  %v1929_v35 = vld [vmem:[%s3726_s7] ss:$0 sm:$0xff] }
 0x15d   : > { %v824_v38 = vsel %vm821_vm2, %v819_v36, %v823_v37 }
 0x15e   : > { %825 = vst [vmem:[#allocation3 + $0x1] sm:$0xf] %v824_v38  ;;  %v1100_v38 = vstv %s1930_s30 }
 0x165   : > { %v827_v45 = vld [vmem:[#allocation3 + $0x1] sm:$0xf] }
 0x166   : > { %v826_v46 = vld [vmem:[#allocation3] sm:$0xf]  ;;  %2237 = vmatmul.mubr.f32.vlgmr.msra.gmra.mrb[0].mxu1 %v827_v45 }
 0x167   : > { %2272 = vmatmul.mubr.f32.vlgmr.msra.gmra.mrb[6].mxu0 %v826_v46  ;;  %2512 = vmatpush3.bf16.msra.mxu1 %v2511_v42  ;;  %v828_v2 = vld [vmem:[#allocation3 + $0x2] sm:$0xf]  ;;  %v1941_v46 = vld [vmem:[%s3727_s8 + $0x80] sm:$0xff] }
 0x168   : > { %2306 = vmatprep.mubr.msk.f32.mxu1 %vm2724_vm1, %v2722_v8  ;;  %2513 = vmatprep.subr.bf16.mxu1 %v2723_v39 }
 0x169   : > { %2325 = vmatprep.mubr.msk.f32.mxu0 %vm2724_vm1, %v2722_v8  ;;  %2536 = vmatpush3.bf16.msra.mxu0 %v2535_v6  ;;  %v1956_v6 = vld [vmem:[%s3729_s10 + $0x120] sm:$0xff] }
 0x16a   : > { %2537 = vmatprep.subr.bf16.mxu0 %v2723_v39  ;;  %v2576_v9 = vpack.c.bf16 %v1958_v7, %v1956_v6  ;;  %v1387_v6 = vld [vmem:[%s3729_s10 + $0x28] sm:$0xff]  ;;  %v1389_v7 = vld [vmem:[%s3729_s10 + $0x38] sm:$0xff] }
 0x16b   : > { %2515 = vmatpush3.bf16.msra.mxu1 %v2514_v47  ;;  %v1942_v47 = vld [vmem:[%s3727_s8 + $0x88] sm:$0xff] }
 0x16c   : > { %2516 = vmatprep.subr.bf16.mxu1 %v2723_v39  ;;  %v2559_v48 = vpack.c.bf16 %v1942_v47, %v1941_v46  ;;  %v1383_v46 = vld [vmem:[%s3729_s10 + $0x8] sm:$0xff]  ;;  %v1385_v47 = vld [vmem:[%s3729_s10 + $0x18] sm:$0xff] }
 0x16d   : > { %2539 = vmatpush3.bf16.msra.mxu0 %v2538_v13  ;;  %v1960_v13 = vld [vmem:[%s3729_s10 + $0x140] sm:$0xff] }
 0x16e   : > { %2540 = vmatprep.subr.bf16.mxu0 %v2723_v39  ;;  %v2580_v15 = vpack.c.bf16 %v1962_v14, %v1960_v13  ;;  %v1391_v14 = vld [vmem:[%s3729_s10 + $0x48] sm:$0xff] }
 0x16f   : > { %2518 = vmatpush3.bf16.msra.mxu1 %v2517_v50  ;;  %v1944_v50 = vld [vmem:[%s3727_s8 + $0x98] sm:$0xff] }
 0x170   : > { %2519 = vmatprep.subr.bf16.mxu1 %v2723_v39 }
 0x171   : > { %2542 = vmatpush3.bf16.msra.mxu0 %v2541_v19  ;;  %v1964_v19 = vld [vmem:[%s3729_s10 + $0x160] sm:$0xff] }
 0x172   : > { %2543 = vmatprep.subr.bf16.mxu0 %v2723_v39  ;;  %v2584_v21 = vpack.c.bf16 %v1966_v20, %v1964_v19  ;;  %v1392_v19 = vld [vmem:[%s3729_s10 + $0x50] sm:$0xff]  ;;  %v1395_v20 = vld [vmem:[%s3729_s10 + $0x68] sm:$0xff] }
 0x173   : > { %2521 = vmatpush3.bf16.msra.mxu1 %v2520_v53  ;;  %v2562_v53 = vpack.c.bf16 %v1944_v50, %v1943_v49  ;;  %v2602_v49 = vpack.c.bf16 %v1385_v47, %v1383_v46  ;;  %v1413_v46 = vld [vmem:[%s3729_s10 + $0xf8] sm:$0xff] }
 0x174   : > { %2522 = vmatprep.subr.bf16.mxu1 %v2723_v39 }
 0x175   : > { %2545 = vmatpush3.bf16.msra.mxu0 %v2544_v25  ;;  %v1968_v25 = vld [vmem:[%s3729_s10 + $0x180] sm:$0xff] }
 0x176   : > { %2558 = vmatprep.subr.bf16.mxu0 %v2723_v39  ;;  %v2588_v27 = vpack.c.bf16 %v1970_v26, %v1968_v25  ;;  %v1396_v25 = vld [vmem:[%s3729_s10 + $0x70] sm:$0xff]  ;;  %v1399_v26 = vld [vmem:[%s3729_s10 + $0x88] sm:$0xff] }
 0x177   : > { %2524 = vmatpush3.bf16.msra.mxu1 %v2523_v56  ;;  %v2565_v56 = vpack.c.bf16 %v1946_v55, %v1945_v54 }
 0x178   : > { %2525 = vmatprep.subr.bf16.mxu1 %v2723_v39 }
 0x17b   : > { %2527 = vmatpush3.bf16.msra.mxu1 %v2526_v59  ;;  %v2568_v59 = vpack.c.bf16 %v1948_v58, %v1947_v57 }
 0x17c   : > { %2528 = vmatprep.subr.bf16.mxu1 %v2723_v39 }
 0x17f   : > { %2530 = vmatpush3.bf16.msra.mxu1 %v2529_v62  ;;  %v1955_v62 = vld [vmem:[%s3729_s10 + $0x118] sm:$0xff] }
 0x180   : > { %2531 = vmatprep.subr.bf16.mxu1 %v2723_v39  ;;  %v2570_v0 = vpack.c.bf16 %v1955_v62, %v1953_v61 }
 0x183   : > { %2533 = vmatpush3.bf16.msra.mxu1 %v2532_v1  ;;  %v1957_v1 = vld [vmem:[%s3729_s10 + $0x128] sm:$0xff] }
 0x184   : > { %2546 = vmatprep.subr.bf16.mxu1 %v2723_v39 }
 0x186   : > { %2307 = vmatmul.mubr.f32.vlgmr.msra.gmra.mrb[2].mxu1 %v828_v2  ;;  %v1959_v2 = vld [vmem:[%s3729_s10 + $0x138] sm:$0xff] }
 0x187   : > { %2344 = vmatprep.mubr.msk.f32.mxu1 %vm2724_vm1, %v2722_v8  ;;  %2548 = vmatpush3.bf16.msra.mxu1 %v2547_v10  ;;  %v2574_v5 = vpack.c.bf16 %v1959_v2, %v1957_v1  ;;  %v1961_v10 = vld [vmem:[%s3729_s10 + $0x148] sm:$0xff] }
 0x188   : > { %2549 = vmatprep.subr.bf16.mxu1 %v2723_v39  ;;  %v2578_v12 = vpack.c.bf16 %v1963_v11, %v1961_v10  ;;  %v2606_v10 = vpack.c.bf16 %v1389_v7, %v1387_v6  ;;  %v1386_v11 = vld [vmem:[%s3729_s10 + $0x20] sm:$0xff]  ;;  %v1997_v6 = vld [vmem:[%s3729_s10 + $0x268] sm:$0xff]  ;;  %v1999_v7 = vld [vmem:[%s3729_s10 + $0x278] sm:$0xff] }
 0x18b   : > { %2551 = vmatpush3.bf16.msra.mxu1 %v2550_v16  ;;  %v1965_v16 = vld [vmem:[%s3729_s10 + $0x168] sm:$0xff] }
 0x18c   : > { %2552 = vmatprep.subr.bf16.mxu1 %v2723_v39  ;;  %v2582_v18 = vpack.c.bf16 %v1967_v17, %v1965_v16 }
 0x18f   : > { %2554 = vmatpush3.bf16.msra.mxu1 %v2553_v22  ;;  %v1969_v22 = vld [vmem:[%s3729_s10 + $0x188] sm:$0xff] }
 0x190   : > { %2555 = vmatprep.subr.bf16.mxu1 %v2723_v39  ;;  %v2586_v24 = vpack.c.bf16 %v1971_v23, %v1969_v22 }
 0x193   : > { %2557 = vmatpush3.bf16.msra.mxu1 %v2556_v28  ;;  %v1973_v28 = vld [vmem:[%s3729_s10 + $0x1a8] sm:$0xff] }
 0x194   : > { %2571 = vmatprep.subr.bf16.mxu1 %v2570_v0 }
 0x239   : > { %v928_v29 = vpop.f32.mrb[0].mxu1 }
 0x23a   : > { %v998_v30 = vpop.f32.mrb[6].mxu0  ;;  %v2238_v32 = vpop.f32.mrb[1].mxu1 }
 0x23b   : > { %v999_v31 = vadd.f32 %v998_v30, %v928_v29  ;;  %v2273_v33 = vpop.f32.mrb[7].mxu0  ;;  %v1975_v29 = vld [vmem:[%s3729_s10 + $0x1b8] sm:$0xff]  ;;  %v1974_v32 = vld [vmem:[%s3729_s10 + $0x1b0] sm:$0xff] }
 0x23c   : > { %v2590_v30 = vpack.c.bf16 %v1975_v29, %v1973_v28 }
 0x259   : > { %v1085_v34 = vpop.f32.mrb[2].mxu1 }
 0x25a   : > { %v1089_v36 = vadd.f32 %v1085_v34, %v999_v31  ;;  %v2308_v37 = vpop.f32.mrb[3].mxu1  ;;  %v1972_v31 = vld [vmem:[%s3729_s10 + $0x1a0] sm:$0xff]  ;;  %v1977_v34 = vld [vmem:[%s3729_s10 + $0x1c8] sm:$0xff] }
 0x25b   : > { %v2592_v33 = vpack.c.bf16 %v1974_v32, %v1972_v31  ;;  %v1976_v37 = vld [vmem:[%s3729_s10 + $0x1c0] sm:$0xff]  ;;  %v1400_v31 = vld [vmem:[%s3729_s10 + $0x90] sm:$0xff]  ;;  %v1403_v32 = vld [vmem:[%s3729_s10 + $0xa8] sm:$0xff] }
 0x25c   : > { %v1097_v40 = vadd.f32 %v1929_v35, %v1089_v36  ;;  %v1979_v35 = vld [vmem:[%s3729_s10 + $0x1d8] sm:$0xff] }
 0x25d   : > { %v2594_v36 = vpack.c.bf16 %v1979_v35, %v1977_v34 }
 0x25e   : > { %vm1099_vm4 = vcmp.ge.f32.partialorder %v1097_v40, 0.0  ;;  %v1101_v41 = vmul.f32 %v1100_v38, %v1097_v40  ;;  %v1978_v38 = vld [vmem:[%s3729_s10 + $0x1d0] sm:$0xff] }
 0x260   : > { %v1102_v42 = vsel %vm1099_vm4, %v1097_v40, %v1101_v41  ;;  %v2596_v40 = vpack.c.bf16 %v1978_v38, %v1976_v37  ;;  %v1981_v41 = vld [vmem:[%s3729_s10 + $0x1e8] sm:$0xff]  ;;  %v1404_v37 = vld [vmem:[%s3729_s10 + $0xb0] sm:$0xff] }
 0x261   : > { %1104 = vst.msk [vmem:[#allocation4 + $0x1] sm:$0xf] %vm1103_vm5, %v1102_v42  ;;  %v1983_v42 = vld [vmem:[%s3729_s10 + $0x1f8] sm:$0xff]  ;;  %v1407_v38 = vld [vmem:[%s3729_s10 + $0xc8] sm:$0xff] }
 0x268   : > { %v1105_v44 = vld [vmem:[#allocation4 + $0x1] sm:$0xf] }
 0x269   : > { %v1107_v45 = vsub.f32 %v1105_v44, %v1106_v43  ;;  %v1980_v43 = vld [vmem:[%s3729_s10 + $0x1e0] sm:$0xff]  ;;  %v2598_v44 = vpack.c.bf16 %v1983_v42, %v1981_v41 }
 0x26b   : > { %1108 = vst.msk [vmem:[#allocation4 + $0x1] sm:$0xf] %vm1103_vm5, %v1107_v45  ;;  %v1982_v45 = vld [vmem:[%s3729_s10 + $0x1f0] sm:$0xff] }
 0x272   : > { %v1110_v51 = vld [vmem:[#allocation4 + $0x1] sm:$0xf] }
 0x273   : > { %v1109_v52 = vld [vmem:[#allocation4] sm:$0xf]  ;;  %2326 = vmatmul.mubr.msk.f32.vlgmr.msra.gmra.mrb[8].mxu0 %vm1129_vm6, %v1110_v51 }
 0x274   : > { %2345 = vmatmul.mubr.msk.f32.vlgmr.msra.gmra.mrb[4].mxu1 %vm1129_vm6, %v1109_v52  ;;  %2560 = vmatpush3.bf16.msra.mxu0 %v2559_v48  ;;  %v1111_v60 = vld [vmem:[#allocation4 + $0x2] sm:$0xf]  ;;  %v2600_v48 = vpack.c.bf16 %v1982_v45, %v1980_v43  ;;  %v1406_v43 = vld [vmem:[%s3729_s10 + $0xc0] sm:$0xff]  ;;  %v1411_v45 = vld [vmem:[%s3729_s10 + $0xe8] sm:$0xff] }
 0x275   : > { %2363 = vmatprep.mubr.msk.f32.mxu0 %vm2724_vm1, %v2722_v8  ;;  %2561 = vmatprep.subr.bf16.mxu0 %v2723_v39 }
 0x276   : > { %1511 = vmatprep.mubr.f32.mxu1 %v2722_v8 }
 0x278   : > { %2563 = vmatpush3.bf16.msra.mxu0 %v2562_v53 }
 0x279   : > { %2564 = vmatprep.subr.bf16.mxu0 %v2723_v39 }
 0x27c   : > { %2566 = vmatpush3.bf16.msra.mxu0 %v2565_v56  ;;  %v1950_v56 = vld [vmem:[%s3728_s9] ss:$0 sm:$0xff] }
 0x27d   : > { %2567 = vmatprep.subr.bf16.mxu0 %v2723_v39  ;;  %v1954_v39 = vld [vmem:[%s3729_s10 + $0x110] sm:$0xff] }
 0x27e   : > { %v2572_v4 = vpack.c.bf16 %v1954_v39, %v1952_v63  ;;  %v1372_v63 = vld [vmem:[#allocation3 + $0x1] sm:$0xf]  ;;  %v1376_v39 = vld [vmem:[%s456_s18] sm:$0xf] }
 0x280   : > { %2569 = vmatpush3.bf16.msra.mxu0 %v2568_v59  ;;  %2573 = vmatpush1.bf16.msra.mxu1 %v2572_v4  ;;  %v1369_v59 = vstv %s1951_s29  ;;  %v1382_v4 = vld [vmem:[%s3729_s10] sm:$0xff] }
 0x281   : > { %2575 = vmatprep.subr.bf16.mxu1 %v2574_v5  ;;  %v1384_v5 = vld [vmem:[%s3729_s10 + $0x10] sm:$0xff] }
 0x283   : > { %2364 = vmatmul.mubr.msk.f32.vlgmr.msra.gmra.mrb[10].mxu0 %vm1129_vm6, %v1111_v60 }
 0x284   : > { %2577 = vmatpush1.bf16.msra.mxu1 %v2576_v9  ;;  %v2604_v9 = vpack.c.bf16 %v1384_v5, %v1382_v4  ;;  %v1992_v4 = vld [vmem:[%s3729_s10 + $0x240] sm:$0xff]  ;;  %v1994_v5 = vld [vmem:[%s3729_s10 + $0x250] sm:$0xff] }
 0x285   : > { %2579 = vmatprep.subr.bf16.mxu1 %v2578_v12  ;;  %v1388_v12 = vld [vmem:[%s3729_s10 + $0x30] sm:$0xff] }
 0x286   : > { %v2608_v16 = vpack.c.bf16 %v1388_v12, %v1386_v11  ;;  %v1998_v11 = vld [vmem:[%s3729_s10 + $0x270] sm:$0xff]  ;;  %v2001_v12 = vld [vmem:[%s3729_s10 + $0x288] sm:$0xff] }
 0x288   : > { %2581 = vmatpush1.bf16.msra.mxu1 %v2580_v15  ;;  %v1393_v15 = vld [vmem:[%s3729_s10 + $0x58] sm:$0xff] }
 0x289   : > { %2583 = vmatprep.subr.bf16.mxu1 %v2582_v18  ;;  %v2610_v17 = vpack.c.bf16 %v1393_v15, %v1391_v14  ;;  %v1390_v18 = vld [vmem:[%s3729_s10 + $0x40] sm:$0xff] }
 0x28a   : > { %v2612_v22 = vpack.c.bf16 %v1392_v19, %v1390_v18  ;;  %v2005_v18 = vld [vmem:[%s3729_s10 + $0x2a8] sm:$0xff]  ;;  %v2007_v19 = vld [vmem:[%s3729_s10 + $0x2b8] sm:$0xff] }
 0x28c   : > { %2585 = vmatpush1.bf16.msra.mxu1 %v2584_v21  ;;  %v1397_v21 = vld [vmem:[%s3729_s10 + $0x78] sm:$0xff] }
 0x28d   : > { %2587 = vmatprep.subr.bf16.mxu1 %v2586_v24  ;;  %v2614_v23 = vpack.c.bf16 %v1397_v21, %v1395_v20  ;;  %v1394_v24 = vld [vmem:[%s3729_s10 + $0x60] sm:$0xff]  ;;  %v2654_v21 = vpack.c.bf16 %v2007_v19, %v2005_v18 }
 0x28e   : > { %v2616_v28 = vpack.c.bf16 %v1396_v25, %v1394_v24  ;;  %v2009_v24 = vld [vmem:[%s3729_s10 + $0x2c8] sm:$0xff]  ;;  %v2011_v25 = vld [vmem:[%s3729_s10 + $0x2d8] sm:$0xff] }
 0x290   : > { %2589 = vmatpush1.bf16.msra.mxu1 %v2588_v27  ;;  %v1401_v27 = vld [vmem:[%s3729_s10 + $0x98] sm:$0xff] }
 0x291   : > { %2591 = vmatprep.subr.bf16.mxu1 %v2590_v30  ;;  %v2618_v29 = vpack.c.bf16 %v1401_v27, %v1399_v26  ;;  %v1398_v30 = vld [vmem:[%s3729_s10 + $0x80] sm:$0xff]  ;;  %v2658_v27 = vpack.c.bf16 %v2011_v25, %v2009_v24 }
 0x292   : > { %v2620_v34 = vpack.c.bf16 %v1400_v31, %v1398_v30  ;;  %v2013_v30 = vld [vmem:[%s3729_s10 + $0x2e8] sm:$0xff]  ;;  %v2015_v31 = vld [vmem:[%s3729_s10 + $0x2f8] sm:$0xff] }
 0x294   : > { %2593 = vmatpush1.bf16.msra.mxu1 %v2592_v33  ;;  %v1405_v33 = vld [vmem:[%s3729_s10 + $0xb8] sm:$0xff] }
 0x295   : > { %2595 = vmatprep.subr.bf16.mxu1 %v2594_v36  ;;  %v2622_v35 = vpack.c.bf16 %v1405_v33, %v1403_v32  ;;  %v1402_v36 = vld [vmem:[%s3729_s10 + $0xa0] sm:$0xff]  ;;  %v2662_v33 = vpack.c.bf16 %v2015_v31, %v2013_v30 }
 0x296   : > { %v2624_v41 = vpack.c.bf16 %v1404_v37, %v1402_v36 }
 0x298   : > { %2597 = vmatpush1.bf16.msra.mxu1 %v2596_v40  ;;  %v1409_v40 = vld [vmem:[%s3729_s10 + $0xd8] sm:$0xff] }
 0x299   : > { %2599 = vmatprep.subr.bf16.mxu1 %v2598_v44  ;;  %v2626_v42 = vpack.c.bf16 %v1409_v40, %v1407_v38  ;;  %v1408_v44 = vld [vmem:[%s3729_s10 + $0xd0] sm:$0xff]  ;;  %v1698_v38 = vshrl.u32 %v462_v3, 7 }
 0x29a   : > { %v2628_v47 = vpack.c.bf16 %v1408_v44, %v1406_v43 }
 0x29b   : > { %v1699_v40 = vsub.s32 0, %v1698_v38 }
 0x29c   : > { %2601 = vmatpush1.bf16.msra.mxu1 %v2600_v48  ;;  %v2630_v48 = vpack.c.bf16 %v1413_v46, %v1411_v45  ;;  %v1712_v46 = vstv %s2016_s17 }
 0x29d   : > { %2603 = vmatprep.subr.bf16.mxu1 %v2602_v49  ;;  %v1410_v49 = vld [vmem:[%s3729_s10 + $0xe0] sm:$0xff] }
 0x346   : > { %v1199_v50 = vpop.f32.mrb[8].mxu0 }
 0x347   : > { %v1272_v51 = vpop.f32.mrb[4].mxu1  ;;  %v2327_v53 = vpop.f32.mrb[9].mxu0 }
 0x348   : > { %v1273_v52 = vadd.f32 %v1272_v51, %v1199_v50  ;;  %v2346_v54 = vpop.f32.mrb[5].mxu1  ;;  %v1412_v50 = vld [vmem:[%s3729_s10 + $0xf0] sm:$0xff]  ;;  %v1985_v51 = vld [vmem:[%s3729_s10 + $0x208] sm:$0xff] }
 0x349   : > { %v2632_v53 = vpack.c.bf16 %v1412_v50, %v1410_v49 }
 0x356   : > { %v1354_v55 = vpop.f32.mrb[10].mxu0 }
 0x357   : > { %v1358_v57 = vadd.f32 %v1354_v55, %v1273_v52  ;;  %v2365_v58 = vpop.f32.mrb[11].mxu0  ;;  %v1987_v52 = vld [vmem:[%s3729_s10 + $0x218] sm:$0xff]  ;;  %v1984_v55 = vld [vmem:[%s3729_s10 + $0x200] sm:$0xff] }
 0x358   : > { %v2634_v54 = vpack.c.bf16 %v1987_v52, %v1985_v51  ;;  %v1991_v58 = vld [vmem:[%s3729_s10 + $0x238] sm:$0xff] }
 0x359   : > { %v1366_v60 = vadd.f32 %v1950_v56, %v1358_v57  ;;  %v1986_v56 = vld [vmem:[%s3729_s10 + $0x210] sm:$0xff]  ;;  %v1989_v57 = vld [vmem:[%s3729_s10 + $0x228] sm:$0xff] }
 0x35b   : > { %vm1368_vm7 = vcmp.ge.f32.partialorder %v1366_v60, 0.0  ;;  %v1370_v61 = vmul.f32 %v1369_v59, %v1366_v60  ;;  %v2636_v59 = vpack.c.bf16 %v1986_v56, %v1984_v55 }
 0x35d   : > { %v1371_v62 = vsel %vm1368_vm7, %v1366_v60, %v1370_v61  ;;  %v2638_v60 = vpack.c.bf16 %v1991_v58, %v1989_v57  ;;  %v1988_v61 = vld [vmem:[%s3729_s10 + $0x220] sm:$0xff] }
 0x35e   : > { %v1373_v0 = vadd.f32 %v1372_v63, %v1371_v62  ;;  %v1990_v62 = vld [vmem:[%s3729_s10 + $0x230] sm:$0xff] }
 0x360   : > { %1374 = vst [vmem:[#allocation3 + $0x1] sm:$0xf] %v1373_v0  ;;  %v1993_v0 = vld [vmem:[%s3729_s10 + $0x248] sm:$0xff] }
 0x367   : > { %v1375_v1 = vld [vmem:[#allocation3 + $0x1] sm:$0xf] }
 0x368   : > { %v1377_v2 = vsub.f32 %v1375_v1, %v1376_v39  ;;  %v1995_v39 = vld [vmem:[%s3729_s10 + $0x258] sm:$0xff]  ;;  %v2640_v1 = vpack.c.bf16 %v1990_v62, %v1988_v61 }
 0x36a   : > { %1378 = vst [vmem:[#allocation3 + $0x1] sm:$0xf] %v1377_v2  ;;  %v2642_v2 = vpack.c.bf16 %v1995_v39, %v1993_v0 }
 0x371   : > { %v1380_v13 = vld [vmem:[#allocation3 + $0x1] sm:$0xf] }
 0x372   : > { %1512 = vmatmul.mubr.f32.vlgmr.msra.gmra.mrb[6].mxu1 %v1380_v13  ;;  %v1379_v63 = vld [vmem:[#allocation3] sm:$0xf]  ;;  %v2003_v13 = vld [vmem:[%s3729_s10 + $0x298] sm:$0xff] }
 0x373   : > { %2605 = vmatpush1.bf16.msra.mxu1 %v2604_v9  ;;  %1582 = vmatprep.mubr.f32.mxu1 %v2722_v8  ;;  %v2646_v9 = vpack.c.bf16 %v1999_v7, %v1997_v6  ;;  %v2650_v15 = vpack.c.bf16 %v2003_v13, %v2001_v12  ;;  %v1381_v37 = vld [vmem:[#allocation3 + $0x2] sm:$0xf] }
 0x374   : > { %2607 = vmatprep.subr.bf16.mxu1 %v2606_v10  ;;  %v1996_v10 = vld [vmem:[%s3729_s10 + $0x260] sm:$0xff] }
 0x375   : > { %v2648_v14 = vpack.c.bf16 %v1998_v11, %v1996_v10 }
 0x377   : > { %2609 = vmatpush1.bf16.msra.mxu1 %v2608_v16  ;;  %v2000_v16 = vld [vmem:[%s3729_s10 + $0x280] sm:$0xff] }
 0x378   : > { %2611 = vmatprep.subr.bf16.mxu1 %v2610_v17  ;;  %v2002_v17 = vld [vmem:[%s3729_s10 + $0x290] sm:$0xff] }
 0x379   : > { %v2652_v20 = vpack.c.bf16 %v2002_v17, %v2000_v16 }
 0x37b   : > { %2613 = vmatpush1.bf16.msra.mxu1 %v2612_v22  ;;  %v2004_v22 = vld [vmem:[%s3729_s10 + $0x2a0] sm:$0xff] }
 0x37c   : > { %2615 = vmatprep.subr.bf16.mxu1 %v2614_v23  ;;  %v2006_v23 = vld [vmem:[%s3729_s10 + $0x2b0] sm:$0xff] }
 0x37d   : > { %v2656_v26 = vpack.c.bf16 %v2006_v23, %v2004_v22 }
 0x37f   : > { %2617 = vmatpush1.bf16.msra.mxu1 %v2616_v28  ;;  %v2008_v28 = vld [vmem:[%s3729_s10 + $0x2c0] sm:$0xff] }
 0x380   : > { %2619 = vmatprep.subr.bf16.mxu1 %v2618_v29  ;;  %v2010_v29 = vld [vmem:[%s3729_s10 + $0x2d0] sm:$0xff] }
 0x381   : > { %v2660_v32 = vpack.c.bf16 %v2010_v29, %v2008_v28 }
 0x383   : > { %2621 = vmatpush1.bf16.msra.mxu1 %v2620_v34  ;;  %v2012_v34 = vld [vmem:[%s3729_s10 + $0x2e0] sm:$0xff] }
 0x384   : > { %2623 = vmatprep.subr.bf16.mxu1 %v2622_v35  ;;  %v2014_v35 = vld [vmem:[%s3729_s10 + $0x2f0] sm:$0xff] }
 0x385   : > { %v2664_v36 = vpack.c.bf16 %v2014_v35, %v2012_v34 }
 0x387   : > { %2625 = vmatpush1.bf16.msra.mxu1 %v2624_v41  ;;  %v1695_v41 = vld [vmem:[%s3730_s11] sm:$0x3] }
 0x388   : > { %2627 = vmatprep.subr.bf16.mxu1 %v2626_v42  ;;  %v1703_v42 = vsub.s32 1, %v1698_v38  ;;  %v1700_v43 = vrot.slane %v1695_v41, %v1699_v40 }
 0x38a   : > { %v1704_v44 = vrot.slane %v1695_v41, %v1703_v42 }
 0x38b   : > { %2629 = vmatpush1.bf16.msra.mxu1 %v2628_v47  ;;  %v1717_v47 = vld [vmem:[%s2877_s28] sm:$0xff] }
 0x38c   : > { %2631 = vmatprep.subr.bf16.mxu1 %v2630_v48  ;;  %v1719_v52 = vcombine.high %v1717_v47, %v1717_v47 }
 0x38f   : > { %2633 = vmatpush1.bf16.msra.mxu1 %v2632_v53 }
 0x390   : > { %2635 = vmatprep.subr.bf16.mxu1 %v2634_v54 }
 0x392   : > { %1583 = vmatmul.mubr.f32.vlgmr.msra.gmra.mrb[6].mxu1 %v1379_v63 }
 0x393   : > { %2637 = vmatpush1.bf16.msra.mxu1 %v2636_v59  ;;  %1686 = vmatprep.mubr.f32.mxu1 %v2722_v8  ;;  %v2644_v8 = vpack.c.bf16 %v1994_v5, %v1992_v4 }
 0x394   : > { %2639 = vmatprep.subr.bf16.mxu1 %v2638_v60 }
 0x397   : > { %2641 = vmatpush1.bf16.msra.mxu1 %v2640_v1 }
 0x398   : > { %2643 = vmatprep.subr.bf16.mxu1 %v2642_v2 }
 0x39b   : > { %2645 = vmatpush1.bf16.msra.mxu1 %v2644_v8 }
 0x39c   : > { %2647 = vmatprep.subr.bf16.mxu1 %v2646_v9 }
 0x39f   : > { %2649 = vmatpush1.bf16.msra.mxu1 %v2648_v14 }
 0x3a0   : > { %2651 = vmatprep.subr.bf16.mxu1 %v2650_v15 }
 0x3a3   : > { %2653 = vmatpush1.bf16.msra.mxu1 %v2652_v20 }
 0x3a4   : > { %2655 = vmatprep.subr.bf16.mxu1 %v2654_v21 }
 0x3a7   : > { %2657 = vmatpush1.bf16.msra.mxu1 %v2656_v26 }
 0x3a8   : > { %2659 = vmatprep.subr.bf16.mxu1 %v2658_v27 }
 0x3ab   : > { %2661 = vmatpush1.bf16.msra.mxu1 %v2660_v32 }
 0x3ac   : > { %2663 = vmatprep.subr.bf16.mxu1 %v2662_v33 }
 0x3af   : > { %2665 = vmatpush1.bf16.msra.mxu1 %v2664_v36 }
 0x3b2   : > { %1687 = vmatmul.mubr.f32.vlgmr.msra.gmra.mrb[6].mxu1 %v1381_v37 }
 0x485   : > { %v1688_v45 = vpop.f32.mrb[6].mxu1 }
 0x486   : > { %v1707_v48 = vadd.f32 %v1700_v43, %v1688_v45  ;;  %v1690_v49 = vpop.f32.mrb[7].mxu1 }
 0x487   : > { %v1708_v50 = vadd.f32 %v1704_v44, %v1690_v49 }
 0x488   : > { %vm1710_vm8 = vcmp.ge.f32.partialorder %v1707_v48, 0.0  ;;  %v1713_v51 = vmul.f32 %v1712_v46, %v1707_v48 }
 0x489   : > { %vm1711_vm9 = vcmp.ge.f32.partialorder %v1708_v50, 0.0  ;;  %v1714_v3 = vmul.f32 %v1712_v46, %v1708_v50 }
 0x48a   : > { %v1715_v53 = vsel %vm1710_vm8, %v1707_v48, %v1713_v51 }
 0x48b   : > { %v1721_v54 = vadd.f32 %v1717_v47, %v1715_v53  ;;  %v1716_v55 = vsel %vm1711_vm9, %v1708_v50, %v1714_v3 }
 0x48c   : > { %v1722_v56 = vadd.f32 %v1719_v52, %v1716_v55 }
 0x48e   : > { %v1725_v57 = vcombine.low %v1721_v54, %v1722_v56 }
 0x490   : > { %1727 = vst [vmem:[%s461_s24] sm:$0xff] %v1725_v57 }
 0x491 PF: > { %s23_s21 = sadd.s32 1, %s2719_s21  }
 0x492   : > { %p20_p1 = scmp.ge.s32.totalorder %s23_s21, 4  }
 0x494   :  { %22 = sbr.rel (!%p20_p1) target bundleno = 1 (0x1), region = 118 }
 0x49b   :  { %1749 = vsyncpa [#allocation6], 1 }
 0x49c   :  { %1751 = vsyncpa [#allocation6 + $0x1], 1 }

</bundles_post_ra>
